<compile_context>
chip_gen: v6e
topology: v6e:2x2x1
jax: 0.10.0
libtpu: 0.0.40
codegen_flags: <defaults>
</compile_context>

<pallas_src>
import numpy as np
import jax
import jax.numpy as jnp
from jax import lax
from jax.experimental import pallas as pl
from jax.experimental.pallas import tpu as pltpu

LANE = 128


def _round_up(x, m):
    return -(-x // m) * m


def _vmem_budget_bytes():
    """Per-generation scoped-VMEM budget (<= ~48 MiB on v7x, ~96 MiB on v5e/v6e)."""
    cap = None
    try:
        cap = getattr(pltpu.get_tpu_info(), "vmem_capacity_bytes", None)
    except Exception:
        cap = None
    if not cap:
        cap = 64 * 1024 * 1024                      # conservative: v7x physical VMEM
    return int(min(cap * 3 // 4, 96 * 1024 * 1024))


def _pick_depth_tile(n, d, hp, kl, nl, budget_bytes):
    """Largest depth tile (divisor of d) whose block set (3 inputs, output, banded weight,
    scale/shift -- all double-buffered -- plus the f32 accumulator) fits the budget."""
    def est(td):
        rows = td * hp
        x_blk = _round_up(rows, 16) * _round_up(kl, LANE) * 2     # bf16 input block
        o_blk = _round_up(rows, 16) * _round_up(nl, LANE) * 2     # bf16 output block
        w_blk = 9 * _round_up(kl, 16) * _round_up(nl, LANE) * 2   # bf16 banded weight
        s_blk = 2 * 8 * _round_up(nl, LANE) * 4                   # f32 scale + shift
        acc = _round_up(rows, 8) * _round_up(nl, LANE) * 4        # f32 accumulator scratch
        return 2 * (3 * x_blk + o_blk + w_blk + s_blk) + acc
    # (8,128) rule on the row axis: td*hp % 8 == 0 unless the block is the full extent.
    valid = [td for td in range(d, 0, -1)
             if d % td == 0 and (td == d or (td * hp) % 8 == 0)]
    fits = [td for td in valid if est(td) <= budget_bytes]
    if not fits:
        # TODO(synk): add H/W tiling with a manual halo DMA for planes too large for one depth slice.
        return valid[-1]
    if n == 1:
        multi = [td for td in fits if d // td >= 2]               # keep both v7x TCs busy
        if multi:
            return multi[0]
    return fits[0]


def _make_conv_bn_relu_kernel(rv, kl, nl):
    """Fused 3x3x3 conv + BN(eval) + ReLU on one (batch, depth-tile) block.

    Rows are the flattened (depth-tile, H+2) grid, the lane axis is (W+2)*Cin.  kw is
    folded into a banded weight, so each (kd, kh) tap is ONE (rv, kl) x (kl, nl) MXU
    matmul with a static row shift of kh (kd handled by the 3 depth-shifted input slabs).
    """
    def kernel(x0_ref, x1_ref, x2_ref, w_ref, scale_ref, shift_ref, o_ref, acc_ref):
        x_refs = (x0_ref, x1_ref, x2_ref)
        for kd in range(3):
            xr = x_refs[kd]
            for kh in range(3):
                t = kd * 3 + kh
                p = jnp.dot(xr[kh:kh + rv, :], w_ref[t],
                            preferred_element_type=jnp.float32)
                if t == 0:
                    acc_ref[...] = p            # init from first tap (no zero fill)
                else:
                    acc_ref[...] += p           # explicit VMEM accumulator, 9 taps total
        # Fused epilogue: conv bias + BatchNorm affine (pre-folded) + ReLU, bf16 store.
        out = jnp.maximum(acc_ref[...] * scale_ref[...] + shift_ref[...], 0.0)
        o_ref[0:rv, :] = out.astype(o_ref.dtype)
        # Tail rows (padded-H grid) are never read by the wrapper -> no tail zero-fill.
    return kernel


def single_conv_forward(x_ncdhw, conv_w, conv_b, bn_w, bn_b, bn_mean, bn_var, eps=1e-5):
    """SingleConv forward: Conv3d(3, padding=1) + BatchNorm3d(eval) + ReLU.  NCDHW in/out."""
    n, cin, d, h, w = x_ncdhw.shape
    cout = conv_w.shape[0]
    hp, wp = h + 2, w + 2
    kl = wp * cin          # lane-dense input axis  : (W+2)*Cin
    nl = w * cout          # lane-dense output axis : W*Cout (no padding to 128)

    # Channels-last, 'same' zero padding, bf16 operands for the MXU.
    xt = jnp.transpose(x_ncdhw, (0, 2, 3, 4, 1)).astype(jnp.bfloat16)   # (N,D,H,W,Cin)
    xp_ = jnp.pad(xt, ((0, 0), (1, 1), (1, 1), (1, 1), (0, 0)))         # (N,D+2,Hp,Wp,Cin)
    # Three depth-shifted slabs flattened over (D, Hp) rows and (Wp, Cin) lanes.
    # TODO(synk): replace with one slab + manual halo DMA once Cin is large enough for the
    #             3x input duplication to matter (negligible at Cin=4).
    x_sh = [xp_[:, k:k + d].reshape(n, d * hp, kl) for k in range(3)]

    # Banded weight: B[kd,kh, w'*Cin+ci, w*Cout+co] = conv_w[co,ci,kd,kh,w'-w] for w'-w in {0,1,2}.
    # TODO(synk): for Cin/Cout >= 128 this inflates the weight by (W+2)/3; switch to a
    #             plain Cin/Cout lane layout (or tile W) in that regime.
    wt = jnp.transpose(conv_w, (2, 3, 4, 1, 0)).astype(jnp.float32)     # (3,3,3,Cin,Cout)
    band = jnp.zeros((3, 3, wp, cin, w, cout), jnp.float32)
    for kw in range(3):
        sel = jnp.zeros((wp, w), jnp.float32).at[kw + jnp.arange(w), jnp.arange(w)].set(1.0)
        band = band + jnp.einsum('dhic,pw->dhpiwc', wt[:, :, kw], sel)
    wb = band.reshape(9, kl, nl).astype(jnp.bfloat16)

    # Fold conv bias + eval-mode BN into one affine, tiled across the W lanes.
    scale = (bn_w / jnp.sqrt(bn_var + eps)).astype(jnp.float32)
    shift = ((conv_b - bn_mean) * scale + bn_b).astype(jnp.float32)
    scale_l = jnp.tile(scale, (w,)).reshape(1, nl)
    shift_l = jnp.tile(shift, (w,)).reshape(1, nl)

    budget = _vmem_budget_bytes()
    td = _pick_depth_tile(n, d, hp, kl, nl, budget)
    rows = td * hp                       # rows per block (padded-H grid)
    rv = rows - 2                        # rows whose kh-shifted window stays in-block
    grid = (n, d // td)

    x_spec = pl.BlockSpec((None, rows, kl), lambda ni, di: (ni, di, 0))
    out_flat = pl.pallas_call(
        _make_conv_bn_relu_kernel(rv, kl, nl),
        out_shape=jax.ShapeDtypeStruct((n, d * hp, nl), jnp.bfloat16),
        grid=grid,
        in_specs=[x_spec, x_spec, x_spec,
                  pl.BlockSpec((9, kl, nl), lambda ni, di: (0, 0, 0)),
                  pl.BlockSpec((1, nl), lambda ni, di: (0, 0)),
                  pl.BlockSpec((1, nl), lambda ni, di: (0, 0))],
        out_specs=pl.BlockSpec((None, rows, nl), lambda ni, di: (ni, di, 0)),
        scratch_shapes=[pltpu.VMEM((rv, nl), jnp.float32)],
        compiler_params=pltpu.CompilerParams(
            dimension_semantics=("parallel", "parallel"),
            vmem_limit_bytes=budget),
    )(x_sh[0], x_sh[1], x_sh[2], wb, scale_l, shift_l)

    # Cheap post-processing on the narrow bf16 slab; back to NCDHW f32 (module semantics).
    # (For layer fusion, the (N, D*Hp, W*Cout) bf16 slab could be consumed directly.)
    y = out_flat.reshape(n, d, hp, w, cout)[:, :, :h]
    return jnp.transpose(y, (0, 4, 1, 2, 3)).astype(jnp.float32)


def single_conv_reference(x_ncdhw, conv_w, conv_b, bn_w, bn_b, bn_mean, bn_var, eps=1e-5):
    """Plain-JAX reference (same bf16 operand rounding as the kernel, f32 accumulation)."""
    dn = lax.conv_dimension_numbers(x_ncdhw.shape, conv_w.shape, ("NCDHW", "OIDHW", "NCDHW"))
    y = lax.conv_general_dilated(
        x_ncdhw.astype(jnp.bfloat16), conv_w.astype(jnp.bfloat16),
        window_strides=(1, 1, 1), padding=((1, 1), (1, 1), (1, 1)),
        dimension_numbers=dn, preferred_element_type=jnp.float32,
        precision=lax.Precision.HIGHEST)
    bc = lambda v: v.reshape(1, -1, 1, 1, 1)
    y = y + bc(conv_b)
    y = (y - bc(bn_mean)) / jnp.sqrt(bc(bn_var) + eps) * bc(bn_w) + bc(bn_b)
    return jnp.maximum(y, 0.0)


if __name__ == "__main__":
    n, cin, cout, d, h, w = 2, 4, 8, 8, 16, 16
    ks = jax.random.split(jax.random.PRNGKey(0), 7)
    x = jax.random.normal(ks[0], (n, cin, d, h, w), jnp.float32)
    conv_w = jax.random.normal(ks[1], (cout, cin, 3, 3, 3), jnp.float32) / np.sqrt(27 * cin)
    conv_b = 0.1 * jax.random.normal(ks[2], (cout,), jnp.float32)
    bn_w = 1.0 + 0.1 * jax.random.normal(ks[3], (cout,), jnp.float32)
    bn_b = 0.1 * jax.random.normal(ks[4], (cout,), jnp.float32)
    bn_mean = 0.1 * jax.random.normal(ks[5], (cout,), jnp.float32)
    bn_var = 1.0 + 0.1 * jax.random.uniform(ks[6], (cout,), jnp.float32)

    fwd = jax.jit(single_conv_forward)
    out = jax.block_until_ready(fwd(x, conv_w, conv_b, bn_w, bn_b, bn_mean, bn_var))

    assert out.shape == (n, cout, d, h, w), out.shape
    assert bool(jnp.all(jnp.isfinite(out)))

    ref = single_conv_reference(x, conv_w, conv_b, bn_w, bn_b, bn_mean, bn_var)
    max_err = float(jnp.max(jnp.abs(out - ref)))
    mean_err = float(jnp.mean(jnp.abs(out - ref)))
    # Kernel output is stored as bf16 (HBM-write win); allow bf16 output rounding.
    assert max_err < 5e-2, f"max abs err vs reference = {max_err}"
    assert mean_err < 5e-3, f"mean abs err vs reference = {mean_err}"
    print("KERNEL_OK")
</pallas_src>

<mosaic_0001>
module attributes {stable_mosaic.version = 11 : i64} {
  func.func @kernel(%arg0: i32, %arg1: i32, %arg2: memref<1x144x72xbf16, #tpu.memory_space<vmem>>, %arg3: memref<1x144x72xbf16, #tpu.memory_space<vmem>>, %arg4: memref<1x144x72xbf16, #tpu.memory_space<vmem>>, %arg5: memref<9x72x128xbf16, #tpu.memory_space<vmem>>, %arg6: memref<1x128xf32, #tpu.memory_space<vmem>>, %arg7: memref<1x128xf32, #tpu.memory_space<vmem>>, %arg8: memref<1x144x128xbf16, #tpu.memory_space<vmem>>, %arg9: memref<142x128xf32, #tpu.memory_space<vmem>>) attributes {dimension_semantics = [#tpu.dimension_semantics<parallel>, #tpu.dimension_semantics<parallel>], iteration_bounds = array<i64: 2, 1>, scalar_prefetch = 0 : i64, scratch_operands = 1 : i64, tpu.core_type = #tpu.core_type<tc>, window_params = [{transform_indices = @transform_0, window_bounds = array<i64: 1, 144, 72>}, {transform_indices = @transform_1, window_bounds = array<i64: 1, 144, 72>}, {transform_indices = @transform_2, window_bounds = array<i64: 1, 144, 72>}, {pipeline_mode = #tpu.pipeline_mode<synchronous>, transform_indices = @transform_3, window_bounds = array<i64: 9, 72, 128>}, {pipeline_mode = #tpu.pipeline_mode<synchronous>, transform_indices = @transform_4, window_bounds = array<i64: 1, 128>}, {pipeline_mode = #tpu.pipeline_mode<synchronous>, transform_indices = @transform_5, window_bounds = array<i64: 1, 128>}, {transform_indices = @transform_6, window_bounds = array<i64: 1, 144, 128>}]} {
    %c0 = arith.constant 0 : index
    %c0_0 = arith.constant 0 : index
    %c0_1 = arith.constant 0 : index
    %0 = vector.load %arg2[%c0, %c0_0, %c0_1] : memref<1x144x72xbf16, #tpu.memory_space<vmem>>, vector<1x142x72xbf16>
    %1 = vector.shape_cast %0 : vector<1x142x72xbf16> to vector<142x72xbf16>
    %c0_2 = arith.constant 0 : index
    %c0_3 = arith.constant 0 : index
    %c0_4 = arith.constant 0 : index
    %2 = vector.load %arg5[%c0_2, %c0_3, %c0_4] : memref<9x72x128xbf16, #tpu.memory_space<vmem>>, vector<1x72x128xbf16>
    %3 = vector.shape_cast %2 : vector<1x72x128xbf16> to vector<72x128xbf16>
    %cst = arith.constant dense<0.000000e+00> : vector<142x128xf32>
    %4 = tpu.matmul %1, %3, %cst {dimension_numbers = #tpu.dot_dimension_numbers<[1], [0], [0], [1], [0, 0, 1, 1], [], []>} : vector<142x72xbf16>, vector<72x128xbf16>, vector<142x128xf32> -> vector<142x128xf32>
    %c0_5 = arith.constant 0 : index
    %c0_6 = arith.constant 0 : index
    %5 = vector.load %arg9[%c0_5, %c0_6] : memref<142x128xf32, #tpu.memory_space<vmem>>, vector<142x128xf32>
    tpu.vector_store %arg9[%c0_5, %c0_6], %4 {strides = array<i32>} : memref<142x128xf32, #tpu.memory_space<vmem>>, vector<142x128xf32>,
    %c0_7 = arith.constant 0 : index
    %c1 = arith.constant 1 : index
    %c0_8 = arith.constant 0 : index
    %6 = vector.load %arg2[%c0_7, %c1, %c0_8] : memref<1x144x72xbf16, #tpu.memory_space<vmem>>, vector<1x142x72xbf16>
    %7 = vector.shape_cast %6 : vector<1x142x72xbf16> to vector<142x72xbf16>
    %c1_9 = arith.constant 1 : index
    %c0_10 = arith.constant 0 : index
    %c0_11 = arith.constant 0 : index
    %8 = vector.load %arg5[%c1_9, %c0_10, %c0_11] : memref<9x72x128xbf16, #tpu.memory_space<vmem>>, vector<1x72x128xbf16>
    %9 = vector.shape_cast %8 : vector<1x72x128xbf16> to vector<72x128xbf16>
    %cst_12 = arith.constant dense<0.000000e+00> : vector<142x128xf32>
    %10 = tpu.matmul %7, %9, %cst_12 {dimension_numbers = #tpu.dot_dimension_numbers<[1], [0], [0], [1], [0, 0, 1, 1], [], []>} : vector<142x72xbf16>, vector<72x128xbf16>, vector<142x128xf32> -> vector<142x128xf32>
    %c0_13 = arith.constant 0 : index
    %c0_14 = arith.constant 0 : index
    %11 = vector.load %arg9[%c0_13, %c0_14] : memref<142x128xf32, #tpu.memory_space<vmem>>, vector<142x128xf32>
    %12 = arith.addf %11, %10 : vector<142x128xf32>
    %c0_15 = arith.constant 0 : index
    %c0_16 = arith.constant 0 : index
    %13 = vector.load %arg9[%c0_15, %c0_16] : memref<142x128xf32, #tpu.memory_space<vmem>>, vector<142x128xf32>
    tpu.vector_store %arg9[%c0_15, %c0_16], %12 {strides = array<i32>} : memref<142x128xf32, #tpu.memory_space<vmem>>, vector<142x128xf32>,
    %c0_17 = arith.constant 0 : index
    %c2 = arith.constant 2 : index
    %c0_18 = arith.constant 0 : index
    %14 = vector.load %arg2[%c0_17, %c2, %c0_18] : memref<1x144x72xbf16, #tpu.memory_space<vmem>>, vector<1x142x72xbf16>
    %15 = vector.shape_cast %14 : vector<1x142x72xbf16> to vector<142x72xbf16>
    %c2_19 = arith.constant 2 : index
    %c0_20 = arith.constant 0 : index
    %c0_21 = arith.constant 0 : index
    %16 = vector.load %arg5[%c2_19, %c0_20, %c0_21] : memref<9x72x128xbf16, #tpu.memory_space<vmem>>, vector<1x72x128xbf16>
    %17 = vector.shape_cast %16 : vector<1x72x128xbf16> to vector<72x128xbf16>
    %cst_22 = arith.constant dense<0.000000e+00> : vector<142x128xf32>
    %18 = tpu.matmul %15, %17, %cst_22 {dimension_numbers = #tpu.dot_dimension_numbers<[1], [0], [0], [1], [0, 0, 1, 1], [], []>} : vector<142x72xbf16>, vector<72x128xbf16>, vector<142x128xf32> -> vector<142x128xf32>
    %c0_23 = arith.constant 0 : index
    %c0_24 = arith.constant 0 : index
    %19 = vector.load %arg9[%c0_23, %c0_24] : memref<142x128xf32, #tpu.memory_space<vmem>>, vector<142x128xf32>
    %20 = arith.addf %19, %18 : vector<142x128xf32>
    %c0_25 = arith.constant 0 : index
    %c0_26 = arith.constant 0 : index
    %21 = vector.load %arg9[%c0_25, %c0_26] : memref<142x128xf32, #tpu.memory_space<vmem>>, vector<142x128xf32>
    tpu.vector_store %arg9[%c0_25, %c0_26], %20 {strides = array<i32>} : memref<142x128xf32, #tpu.memory_space<vmem>>, vector<142x128xf32>,
    %c0_27 = arith.constant 0 : index
    %c0_28 = arith.constant 0 : index
    %c0_29 = arith.constant 0 : index
    %22 = vector.load %arg3[%c0_27, %c0_28, %c0_29] : memref<1x144x72xbf16, #tpu.memory_space<vmem>>, vector<1x142x72xbf16>
    %23 = vector.shape_cast %22 : vector<1x142x72xbf16> to vector<142x72xbf16>
    %c3 = arith.constant 3 : index
    %c0_30 = arith.constant 0 : index
    %c0_31 = arith.constant 0 : index
    %24 = vector.load %arg5[%c3, %c0_30, %c0_31] : memref<9x72x128xbf16, #tpu.memory_space<vmem>>, vector<1x72x128xbf16>
    %25 = vector.shape_cast %24 : vector<1x72x128xbf16> to vector<72x128xbf16>
    %cst_32 = arith.constant dense<0.000000e+00> : vector<142x128xf32>
    %26 = tpu.matmul %23, %25, %cst_32 {dimension_numbers = #tpu.dot_dimension_numbers<[1], [0], [0], [1], [0, 0, 1, 1], [], []>} : vector<142x72xbf16>, vector<72x128xbf16>, vector<142x128xf32> -> vector<142x128xf32>
    %c0_33 = arith.constant 0 : index
    %c0_34 = arith.constant 0 : index
    %27 = vector.load %arg9[%c0_33, %c0_34] : memref<142x128xf32, #tpu.memory_space<vmem>>, vector<142x128xf32>
    %28 = arith.addf %27, %26 : vector<142x128xf32>
    %c0_35 = arith.constant 0 : index
    %c0_36 = arith.constant 0 : index
    %29 = vector.load %arg9[%c0_35, %c0_36] : memref<142x128xf32, #tpu.memory_space<vmem>>, vector<142x128xf32>
    tpu.vector_store %arg9[%c0_35, %c0_36], %28 {strides = array<i32>} : memref<142x128xf32, #tpu.memory_space<vmem>>, vector<142x128xf32>,
    %c0_37 = arith.constant 0 : index
    %c1_38 = arith.constant 1 : index
    %c0_39 = arith.constant 0 : index
    %30 = vector.load %arg3[%c0_37, %c1_38, %c0_39] : memref<1x144x72xbf16, #tpu.memory_space<vmem>>, vector<1x142x72xbf16>
    %31 = vector.shape_cast %30 : vector<1x142x72xbf16> to vector<142x72xbf16>
    %c4 = arith.constant 4 : index
    %c0_40 = arith.constant 0 : index
    %c0_41 = arith.constant 0 : index
    %32 = vector.load %arg5[%c4, %c0_40, %c0_41] : memref<9x72x128xbf16, #tpu.memory_space<vmem>>, vector<1x72x128xbf16>
    %33 = vector.shape_cast %32 : vector<1x72x128xbf16> to vector<72x128xbf16>
    %cst_42 = arith.constant dense<0.000000e+00> : vector<142x128xf32>
    %34 = tpu.matmul %31, %33, %cst_42 {dimension_numbers = #tpu.dot_dimension_numbers<[1], [0], [0], [1], [0, 0, 1, 1], [], []>} : vector<142x72xbf16>, vector<72x128xbf16>, vector<142x128xf32> -> vector<142x128xf32>
    %c0_43 = arith.constant 0 : index
    %c0_44 = arith.constant 0 : index
    %35 = vector.load %arg9[%c0_43, %c0_44] : memref<142x128xf32, #tpu.memory_space<vmem>>, vector<142x128xf32>
    %36 = arith.addf %35, %34 : vector<142x128xf32>
    %c0_45 = arith.constant 0 : index
    %c0_46 = arith.constant 0 : index
    %37 = vector.load %arg9[%c0_45, %c0_46] : memref<142x128xf32, #tpu.memory_space<vmem>>, vector<142x128xf32>
    tpu.vector_store %arg9[%c0_45, %c0_46], %36 {strides = array<i32>} : memref<142x128xf32, #tpu.memory_space<vmem>>, vector<142x128xf32>,
    %c0_47 = arith.constant 0 : index
    %c2_48 = arith.constant 2 : index
    %c0_49 = arith.constant 0 : index
    %38 = vector.load %arg3[%c0_47, %c2_48, %c0_49] : memref<1x144x72xbf16, #tpu.memory_space<vmem>>, vector<1x142x72xbf16>
    %39 = vector.shape_cast %38 : vector<1x142x72xbf16> to vector<142x72xbf16>
    %c5 = arith.constant 5 : index
    %c0_50 = arith.constant 0 : index
    %c0_51 = arith.constant 0 : index
    %40 = vector.load %arg5[%c5, %c0_50, %c0_51] : memref<9x72x128xbf16, #tpu.memory_space<vmem>>, vector<1x72x128xbf16>
    %41 = vector.shape_cast %40 : vector<1x72x128xbf16> to vector<72x128xbf16>
    %cst_52 = arith.constant dense<0.000000e+00> : vector<142x128xf32>
    %42 = tpu.matmul %39, %41, %cst_52 {dimension_numbers = #tpu.dot_dimension_numbers<[1], [0], [0], [1], [0, 0, 1, 1], [], []>} : vector<142x72xbf16>, vector<72x128xbf16>, vector<142x128xf32> -> vector<142x128xf32>
    %c0_53 = arith.constant 0 : index
    %c0_54 = arith.constant 0 : index
    %43 = vector.load %arg9[%c0_53, %c0_54] : memref<142x128xf32, #tpu.memory_space<vmem>>, vector<142x128xf32>
    %44 = arith.addf %43, %42 : vector<142x128xf32>
    %c0_55 = arith.constant 0 : index
    %c0_56 = arith.constant 0 : index
    %45 = vector.load %arg9[%c0_55, %c0_56] : memref<142x128xf32, #tpu.memory_space<vmem>>, vector<142x128xf32>
    tpu.vector_store %arg9[%c0_55, %c0_56], %44 {strides = array<i32>} : memref<142x128xf32, #tpu.memory_space<vmem>>, vector<142x128xf32>,
    %c0_57 = arith.constant 0 : index
    %c0_58 = arith.constant 0 : index
    %c0_59 = arith.constant 0 : index
    %46 = vector.load %arg4[%c0_57, %c0_58, %c0_59] : memref<1x144x72xbf16, #tpu.memory_space<vmem>>, vector<1x142x72xbf16>
    %47 = vector.shape_cast %46 : vector<1x142x72xbf16> to vector<142x72xbf16>
    %c6 = arith.constant 6 : index
    %c0_60 = arith.constant 0 : index
    %c0_61 = arith.constant 0 : index
    %48 = vector.load %arg5[%c6, %c0_60, %c0_61] : memref<9x72x128xbf16, #tpu.memory_space<vmem>>, vector<1x72x128xbf16>
    %49 = vector.shape_cast %48 : vector<1x72x128xbf16> to vector<72x128xbf16>
    %cst_62 = arith.constant dense<0.000000e+00> : vector<142x128xf32>
    %50 = tpu.matmul %47, %49, %cst_62 {dimension_numbers = #tpu.dot_dimension_numbers<[1], [0], [0], [1], [0, 0, 1, 1], [], []>} : vector<142x72xbf16>, vector<72x128xbf16>, vector<142x128xf32> -> vector<142x128xf32>
    %c0_63 = arith.constant 0 : index
    %c0_64 = arith.constant 0 : index
    %51 = vector.load %arg9[%c0_63, %c0_64] : memref<142x128xf32, #tpu.memory_space<vmem>>, vector<142x128xf32>
    %52 = arith.addf %51, %50 : vector<142x128xf32>
    %c0_65 = arith.constant 0 : index
    %c0_66 = arith.constant 0 : index
    %53 = vector.load %arg9[%c0_65, %c0_66] : memref<142x128xf32, #tpu.memory_space<vmem>>, vector<142x128xf32>
    tpu.vector_store %arg9[%c0_65, %c0_66], %52 {strides = array<i32>} : memref<142x128xf32, #tpu.memory_space<vmem>>, vector<142x128xf32>,
    %c0_67 = arith.constant 0 : index
    %c1_68 = arith.constant 1 : index
    %c0_69 = arith.constant 0 : index
    %54 = vector.load %arg4[%c0_67, %c1_68, %c0_69] : memref<1x144x72xbf16, #tpu.memory_space<vmem>>, vector<1x142x72xbf16>
    %55 = vector.shape_cast %54 : vector<1x142x72xbf16> to vector<142x72xbf16>
    %c7 = arith.constant 7 : index
    %c0_70 = arith.constant 0 : index
    %c0_71 = arith.constant 0 : index
    %56 = vector.load %arg5[%c7, %c0_70, %c0_71] : memref<9x72x128xbf16, #tpu.memory_space<vmem>>, vector<1x72x128xbf16>
    %57 = vector.shape_cast %56 : vector<1x72x128xbf16> to vector<72x128xbf16>
    %cst_72 = arith.constant dense<0.000000e+00> : vector<142x128xf32>
    %58 = tpu.matmul %55, %57, %cst_72 {dimension_numbers = #tpu.dot_dimension_numbers<[1], [0], [0], [1], [0, 0, 1, 1], [], []>} : vector<142x72xbf16>, vector<72x128xbf16>, vector<142x128xf32> -> vector<142x128xf32>
    %c0_73 = arith.constant 0 : index
    %c0_74 = arith.constant 0 : index
    %59 = vector.load %arg9[%c0_73, %c0_74] : memref<142x128xf32, #tpu.memory_space<vmem>>, vector<142x128xf32>
    %60 = arith.addf %59, %58 : vector<142x128xf32>
    %c0_75 = arith.constant 0 : index
    %c0_76 = arith.constant 0 : index
    %61 = vector.load %arg9[%c0_75, %c0_76] : memref<142x128xf32, #tpu.memory_space<vmem>>, vector<142x128xf32>
    tpu.vector_store %arg9[%c0_75, %c0_76], %60 {strides = array<i32>} : memref<142x128xf32, #tpu.memory_space<vmem>>, vector<142x128xf32>,
    %c0_77 = arith.constant 0 : index
    %c2_78 = arith.constant 2 : index
    %c0_79 = arith.constant 0 : index
    %62 = vector.load %arg4[%c0_77, %c2_78, %c0_79] : memref<1x144x72xbf16, #tpu.memory_space<vmem>>, vector<1x142x72xbf16>
    %63 = vector.shape_cast %62 : vector<1x142x72xbf16> to vector<142x72xbf16>
    %c8 = arith.constant 8 : index
    %c0_80 = arith.constant 0 : index
    %c0_81 = arith.constant 0 : index
    %64 = vector.load %arg5[%c8, %c0_80, %c0_81] : memref<9x72x128xbf16, #tpu.memory_space<vmem>>, vector<1x72x128xbf16>
    %65 = vector.shape_cast %64 : vector<1x72x128xbf16> to vector<72x128xbf16>
    %cst_82 = arith.constant dense<0.000000e+00> : vector<142x128xf32>
    %66 = tpu.matmul %63, %65, %cst_82 {dimension_numbers = #tpu.dot_dimension_numbers<[1], [0], [0], [1], [0, 0, 1, 1], [], []>} : vector<142x72xbf16>, vector<72x128xbf16>, vector<142x128xf32> -> vector<142x128xf32>
    %c0_83 = arith.constant 0 : index
    %c0_84 = arith.constant 0 : index
    %67 = vector.load %arg9[%c0_83, %c0_84] : memref<142x128xf32, #tpu.memory_space<vmem>>, vector<142x128xf32>
    %68 = arith.addf %67, %66 : vector<142x128xf32>
    %c0_85 = arith.constant 0 : index
    %c0_86 = arith.constant 0 : index
    %69 = vector.load %arg9[%c0_85, %c0_86] : memref<142x128xf32, #tpu.memory_space<vmem>>, vector<142x128xf32>
    tpu.vector_store %arg9[%c0_85, %c0_86], %68 {strides = array<i32>} : memref<142x128xf32, #tpu.memory_space<vmem>>, vector<142x128xf32>,
    %c0_87 = arith.constant 0 : index
    %c0_88 = arith.constant 0 : index
    %70 = vector.load %arg9[%c0_87, %c0_88] : memref<142x128xf32, #tpu.memory_space<vmem>>, vector<142x128xf32>
    %c0_89 = arith.constant 0 : index
    %c0_90 = arith.constant 0 : index
    %71 = vector.load %arg6[%c0_89, %c0_90] : memref<1x128xf32, #tpu.memory_space<vmem>>, vector<1x128xf32>
    %72 = vector.broadcast %71 : vector<1x128xf32> to vector<142x128xf32>
    %73 = arith.mulf %70, %72 : vector<142x128xf32>
    %c0_91 = arith.constant 0 : index
    %c0_92 = arith.constant 0 : index
    %74 = vector.load %arg7[%c0_91, %c0_92] : memref<1x128xf32, #tpu.memory_space<vmem>>, vector<1x128xf32>
    %75 = vector.broadcast %74 : vector<1x128xf32> to vector<142x128xf32>
    %76 = arith.addf %73, %75 : vector<142x128xf32>
    %cst_93 = arith.constant 0.000000e+00 : f32
    %77 = vector.broadcast %cst_93 : f32 to vector<142x128xf32>
    %78 = arith.maximumf %76, %77 : vector<142x128xf32>
    %79 = arith.truncf %78 : vector<142x128xf32> to vector<142x128xbf16>
    %c0_94 = arith.constant 0 : index
    %c0_95 = arith.constant 0 : index
    %c0_96 = arith.constant 0 : index
    %80 = vector.load %arg8[%c0_94, %c0_95, %c0_96] : memref<1x144x128xbf16, #tpu.memory_space<vmem>>, vector<1x142x128xbf16>
    %81 = vector.shape_cast %80 : vector<1x142x128xbf16> to vector<142x128xbf16>
    %82 = vector.shape_cast %79 : vector<142x128xbf16> to vector<1x142x128xbf16>
    tpu.vector_store %arg8[%c0_94, %c0_95, %c0_96], %82 {strides = array<i32>} : memref<1x144x128xbf16, #tpu.memory_space<vmem>>, vector<1x142x128xbf16>,
    return
  }
  func.func @transform_0(%arg0: i32, %arg1: i32) -> (i32, i32, i32) {
    %c0_i32 = arith.constant 0 : i32
    %c0_i32_0 = arith.constant 0 : i32
    return %arg0, %arg1, %c0_i32 : i32, i32, i32
  }
  func.func @transform_1(%arg0: i32, %arg1: i32) -> (i32, i32, i32) {
    %c0_i32 = arith.constant 0 : i32
    %c0_i32_0 = arith.constant 0 : i32
    return %arg0, %arg1, %c0_i32 : i32, i32, i32
  }
  func.func @transform_2(%arg0: i32, %arg1: i32) -> (i32, i32, i32) {
    %c0_i32 = arith.constant 0 : i32
    %c0_i32_0 = arith.constant 0 : i32
    return %arg0, %arg1, %c0_i32 : i32, i32, i32
  }
  func.func @transform_3(%arg0: i32, %arg1: i32) -> (i32, i32, i32) {
    %c0_i32 = arith.constant 0 : i32
    %c0_i32_0 = arith.constant 0 : i32
    %c0_i32_1 = arith.constant 0 : i32
    %c0_i32_2 = arith.constant 0 : i32
    return %c0_i32, %c0_i32_0, %c0_i32_1 : i32, i32, i32
  }
  func.func @transform_4(%arg0: i32, %arg1: i32) -> (i32, i32) {
    %c0_i32 = arith.constant 0 : i32
    %c0_i32_0 = arith.constant 0 : i32
    %c0_i32_1 = arith.constant 0 : i32
    return %c0_i32, %c0_i32_0 : i32, i32
  }
  func.func @transform_5(%arg0: i32, %arg1: i32) -> (i32, i32) {
    %c0_i32 = arith.constant 0 : i32
    %c0_i32_0 = arith.constant 0 : i32
    %c0_i32_1 = arith.constant 0 : i32
    return %c0_i32, %c0_i32_0 : i32, i32
  }
  func.func @transform_6(%arg0: i32, %arg1: i32) -> (i32, i32, i32) {
    %c0_i32 = arith.constant 0 : i32
    %c0_i32_0 = arith.constant 0 : i32
    return %arg0, %arg1, %c0_i32 : i32, i32, i32
  }
}

</mosaic_0001>

<bundles_post_ra>
// kernel: tile.13
= control target key start
LH: loop header
LB: loop body
LE: loop exit
PB: predicated region body
PF: predicated region fallthrough
CT: control target
= control target key end

     0   :  { %s28_s0 = inlined_call_operand.vmem [shape: f32[8], index: 0, kind: input, shape index: {}]   ;;  %s29_s1 = inlined_call_operand.vmem [shape: f32[16,8], index: 1, kind: output, shape index: {}]  }
   0x1   :  { %v4_v0 = vld [vmem:[%s28_s0] ss:$0 sm:$0xff] }
   0x2   :  { %5 = vst [vmem:[%s29_s1] sm:$0xff] %v4_v0  ;;  %8 = vst [vmem:[%s29_s1 + $0x8] sm:$0xff] %v4_v0 }

// kernel: tile.14
= control target key start
LH: loop header
LB: loop body
LE: loop exit
PB: predicated region body
PF: predicated region fallthrough
CT: control target
= control target key end

     0   :  { %s133_s10 = smov 120   ;;  %s134_s11 = smov 104   ;;  %vm3_vm0 = vcmask 64512   ;;  %vm9_vm1 = vcmask 1048512   ;;  %vm15_vm2 = vcmask 982912   ;;  %vm21_vm3 = vcmask 917312   ;;  %s209_s0 = inlined_call_operand.vmem [shape: f32[16,8], index: 0, kind: input, shape index: {}]   ;;  %s210_s1 = inlined_call_operand.vmem [shape: f32[1,128], index: 1, kind: output, shape index: {}]  }
   0x1   :  { %v103_v0 = vld [vmem:[%s209_s0 + $0xf] sm:$0x1]   ;;  %v105_v1 = vld [vmem:[%s209_s0 + $0xd] sm:$0x1]   ;;  %v104_v2 = vld [vmem:[%s209_s0 + $0xe] sm:$0x1]  }
   0x2   :  { %7 = vrot.lane.b32.xlu0 %v103_v0, %s133_s10  ;;  %19 = vrot.lane.b32.xlu1 %v105_v1, %s134_s11  ;;  %v106_v3 = vld [vmem:[%s209_s0 + $0xc] sm:$0x1]   ;;  %s135_s16 = smov 112   ;;  %s136_s17 = smov 96   ;;  %v107_v4 = vld [vmem:[%s209_s0 + $0xb] sm:$0x1]  }
   0x3   :  { %v108_v5 = vld [vmem:[%s209_s0 + $0xa] sm:$0x1]   ;;  %v2_v6 = vld [vmem:[%s209_s0] sm:$0x1]   ;;  %s137_s24 = smov 88   ;;  %s138_s25 = smov 80  }
   0x4   :  { %4 = vst.msk [vmem:[#allocation0] sm:$0x1] %vm3_vm0, %v2_v6   ;;  %v109_v7 = vld [vmem:[%s209_s0 + $0x9] sm:$0x1]   ;;  %v110_v8 = vld [vmem:[%s209_s0 + $0x8] sm:$0x1]  }
   0x5   :  { %s139_s30 = smov 72   ;;  %s140_s2 = smov 64   ;;  %v111_v9 = vld [vmem:[%s209_s0 + $0x7] sm:$0x1]   ;;  %v112_v10 = vld [vmem:[%s209_s0 + $0x6] sm:$0x1]  }
   0x6   :  { %13 = vrot.lane.b32.xlu0 %v104_v2, %s135_s16  ;;  %25 = vrot.lane.b32.xlu1 %v106_v3, %s136_s17  ;;  %s141_s7 = smov 56   ;;  %s142_s8 = smov 48   ;;  %v113_v11 = vld [vmem:[%s209_s0 + $0x5] sm:$0x1]   ;;  %v114_v12 = vld [vmem:[%s209_s0 + $0x4] sm:$0x1]  }
   0x7   :  { %s143_s13 = smov 40   ;;  %s144_s14 = smov 32   ;;  %v115_v13 = vld [vmem:[%s209_s0 + $0x3] sm:$0x1]   ;;  %v116_v14 = vld [vmem:[%s209_s0 + $0x2] sm:$0x1]  }
   0x8   :  { %s145_s19 = smov 24   ;;  %s146_s20 = smov 16   ;;  %v117_v15 = vld [vmem:[%s209_s0 + $0x1] sm:$0x1]   ;;  %vm27_vm4 = vcmask 851712   ;;  %vm33_vm5 = vcmask 786112  }
   0x9   :  { %s147_s0 = smov 8   ;;  %vm39_vm6 = vcmask 720512   ;;  %vm45_vm7 = vcmask 654912   ;;  %vm51_vm8 = vcmask 589312   ;;  %vm57_vm9 = vcmask 523712  }
   0xa   :  { %31 = vrot.lane.b32.xlu0 %v107_v4, %s137_s24  ;;  %37 = vrot.lane.b32.xlu1 %v108_v5, %s138_s25  ;;  %vm63_vm10 = vcmask 458112   ;;  %vm69_vm11 = vcmask 392512   ;;  %vm75_vm12 = vcmask 326912   ;;  %vm81_vm13 = vcmask 261312  }
   0xb   :  { %vm87_vm14 = vcmask 195712   ;;  %vm93_vm15 = vcmask 130112  }
   0xe   :  { %43 = vrot.lane.b32.xlu0 %v109_v7, %s139_s30  ;;  %49 = vrot.lane.b32.xlu1 %v110_v8, %s140_s2 }
  0x12   :  { %55 = vrot.lane.b32.xlu0 %v111_v9, %s141_s7  ;;  %61 = vrot.lane.b32.xlu1 %v112_v10, %s142_s8 }
  0x16   :  { %67 = vrot.lane.b32.xlu0 %v113_v11, %s143_s13  ;;  %73 = vrot.lane.b32.xlu1 %v114_v12, %s144_s14 }
  0x1a   :  { %79 = vrot.lane.b32.xlu0 %v115_v13, %s145_s19  ;;  %85 = vrot.lane.b32.xlu1 %v116_v14, %s146_s20 }
  0x1e   :  { %91 = vrot.lane.b32.xlu0 %v117_v15, %s147_s0 }
  0x74   :  { %v8_v16 = vpop.permute.xlu0 %7   ;;  %v20_v17 = vpop.permute.xlu1 %19  }
  0x75   :  { %10 = vst.msk [vmem:[#allocation0] sm:$0x1] %vm9_vm1, %v8_v16  }
  0x78   :  { %v14_v18 = vpop.permute.xlu0 %13   ;;  %v26_v19 = vpop.permute.xlu1 %25  }
  0x79   :  { %16 = vst.msk [vmem:[#allocation0] sm:$0x1] %vm15_vm2, %v14_v18  }
  0x7a   :  { %22 = vst.msk [vmem:[#allocation0] sm:$0x1] %vm21_vm3, %v20_v17  }
  0x7b   :  { %28 = vst.msk [vmem:[#allocation0] sm:$0x1] %vm27_vm4, %v26_v19  }
  0x7c   :  { %v32_v20 = vpop.permute.xlu0 %31   ;;  %v38_v21 = vpop.permute.xlu1 %37  }
  0x7d   :  { %34 = vst.msk [vmem:[#allocation0] sm:$0x1] %vm33_vm5, %v32_v20  }
  0x7e   :  { %40 = vst.msk [vmem:[#allocation0] sm:$0x1] %vm39_vm6, %v38_v21  }
  0x80   :  { %v44_v22 = vpop.permute.xlu0 %43   ;;  %v50_v23 = vpop.permute.xlu1 %49  }
  0x81   :  { %46 = vst.msk [vmem:[#allocation0] sm:$0x1] %vm45_vm7, %v44_v22  }
  0x82   :  { %52 = vst.msk [vmem:[#allocation0] sm:$0x1] %vm51_vm8, %v50_v23  }
  0x84   :  { %v56_v24 = vpop.permute.xlu0 %55   ;;  %v62_v25 = vpop.permute.xlu1 %61  }
  0x85   :  { %58 = vst.msk [vmem:[#allocation0] sm:$0x1] %vm57_vm9, %v56_v24  }
  0x86   :  { %64 = vst.msk [vmem:[#allocation0] sm:$0x1] %vm63_vm10, %v62_v25  }
  0x88   :  { %v68_v26 = vpop.permute.xlu0 %67   ;;  %v74_v27 = vpop.permute.xlu1 %73  }
  0x89   :  { %70 = vst.msk [vmem:[#allocation0] sm:$0x1] %vm69_vm11, %v68_v26  }
  0x8a   :  { %76 = vst.msk [vmem:[#allocation0] sm:$0x1] %vm75_vm12, %v74_v27  }
  0x8c   :  { %v80_v28 = vpop.permute.xlu0 %79   ;;  %v86_v29 = vpop.permute.xlu1 %85  }
  0x8d   :  { %82 = vst.msk [vmem:[#allocation0] sm:$0x1] %vm81_vm13, %v80_v28  }
  0x8e   :  { %88 = vst.msk [vmem:[#allocation0] sm:$0x1] %vm87_vm14, %v86_v29  }
  0x90   :  { %v92_v30 = vpop.permute.xlu0 %91  }
  0x91   :  { %94 = vst.msk [vmem:[#allocation0] sm:$0x1] %vm93_vm15, %v92_v30  }
  0x98   :  { %v99_v31 = vld [vmem:[#allocation0] sm:$0x1] }
  0x99   :  { %102 = vst [vmem:[%s210_s1] sm:$0x1] %v99_v31 }

// kernel: single_conv_forward.1
= control target key start
LH: loop header
LB: loop body
LE: loop exit
PB: predicated region body
PF: predicated region fallthrough
CT: control target
= control target key end

     0   :  { %s4634_s21 = smov 0   ;;  %s4636_s22 = smov 0   ;;  %s5513_s0 = inlined_call_operand.vmem [shape: bf16[2,144,72], index: 0, kind: input, shape index: {}]   ;;  %s5514_s1 = inlined_call_operand.vmem [shape: bf16[2,144,72], index: 1, kind: input, shape index: {}]   ;;  %s5515_s2 = inlined_call_operand.vmem [shape: bf16[2,144,72], index: 2, kind: input, shape index: {}]   ;;  %s5516_s3 = inlined_call_operand.vmem [shape: bf16[9,72,128], index: 3, kind: input, shape index: {}]   ;;  %s5517_s4 = inlined_call_operand.vmem [shape: f32[1,128], index: 4, kind: input, shape index: {}]   ;;  %s5518_s5 = inlined_call_operand.vmem [shape: f32[1,128], index: 5, kind: input, shape index: {}]   ;;  %s5519_s6 = inlined_call_operand.vmem [shape: bf16[2,144,128], index: 6, kind: output, shape index: {}]  }
   0x1   :  { %s4638_s23 = smov 0  }
   0x2 LB: > { %s28_s24 = sadd.s32 1, %s4591_s22  ;;  %p3499_p0 = scmp.ge.s32.totalorder %s4595_s23, 1  ;;  %s4595_s23 = sphi %s4638_s23, %s16_s23   ;;  %s4591_s22 = sphi %s4636_s22, %s5521_s22   ;;  %s4587_s21 = sphi %s4634_s21, %s5520_s21  }
   0x3   : > { %p30_p1 = scmp.ge.s32.totalorder %s28_s24, 2  ;;  %p267_p2 = scmp.lt.s32.totalorder %s4595_s23, 3 }
   0x5   : > { %s5523_s24 = smov (%p30_p1, %s28_s24), 0  ;;  %p268_p3 = pnand %p3499_p0, %p267_p2 }
   0x6   : > { %p324_p4 = scmp.lt.s32.totalorder (!%p268_p3), %s4587_s21, 1 }
   0x7   : > { %271 = sbr.rel (%p268_p3) target bundleno = 572 (0x23c), region = 44 }
   0xc   : > { %v4447_v0 = vld [vmem:[%s5516_s3 + $0x20] ss:$0 sps:$4 sm:$0xff]   ;;  %vm491_vm0 = vcmask 1043456   ;;  %v4597_v1 = vmov 0.0   ;;  %vm4598_vm1 = vmmov 0   ;;  %v4448_v3 = vld [vmem:[%s5516_s3 + $0x18] sm:$0xff]  }
   0xd   : > { %3996 = vmatprep.subr.bf16.mxu0 %v4597_v1  ;;  %4410 = vmatprep.subr.bf16.mxu1 %v4597_v1  ;;  %v493_v2 = vsel %vm491_vm0, %v4447_v0, 0  ;;  %s5525_s21 = smov (!%p324_p4, %s4587_s21), 1  ;;  %v4449_v4 = vld [vmem:[%s5516_s3 + $0x10] sm:$0xff]   ;;  %v4450_v5 = vld [vmem:[%s5516_s3 + $0x8] sm:$0xff]   ;;  %v4451_v6 = vld [vmem:[%s5516_s3] sm:$0xff]   ;;  %vm463_vm2 = vcmask 588800  }
   0xe   : > { %4006 = vmatprep.mubr.msk.bf16.mxu0 %vm4598_vm1, %v4597_v1  ;;  %4026 = vmatprep.mubr.msk.bf16.mxu1 %vm4598_vm1, %v4597_v1  ;;  %s4670_s7 = smul.u32 72, %s5525_s21  ;;  %v4454_v7 = vld [vmem:[%s5516_s3 + $0x44] ss:$0 sps:$4 sm:$0xff]   ;;  %v4455_v8 = vld [vmem:[%s5516_s3 + $0x68] ss:$0 sps:$4 sm:$0xff]   ;;  %v4458_v13 = vld [vmem:[%s5516_s3 + $0x3c] sm:$0xff]  }
   0xf   : > { %3997 = vmatpush3.bf16.msra.mxu0 %v493_v2  ;;  %4415 = vmatpush3.bf16.msra.mxu1 %v493_v2  ;;  %v818_v11 = vsel %vm491_vm0, %v4454_v7, 0  ;;  %v1125_v12 = vsel %vm491_vm0, %v4455_v8, 0  ;;  %v4459_v14 = vld [vmem:[%s5516_s3 + $0x60] sm:$0xff]   ;;  %v4460_v17 = vld [vmem:[%s5516_s3 + $0x34] sm:$0xff]   ;;  %v4464_v19 = vld [vmem:[%s5516_s3 + $0x2c] sm:$0xff]   ;;  %vm1052_vm4 = vcmask 1046528  }
  0x10   : > { %3998 = vmatprep.subr.bf16.mxu0 %v4597_v1  ;;  %4411 = vmatprep.subr.bf16.mxu1 %v4597_v1  ;;  %s4678_s10 = scalar_lea.vmem %s5513_s0, %s4670_s7  ;;  %v4463_v18 = vld [vmem:[%s5516_s3 + $0x58] sm:$0xff]   ;;  %v4468_v21 = vld [vmem:[%s5516_s3 + $0x50] sm:$0xff]   ;;  %v4467_v24 = vld [vmem:[%s5516_s3 + $0x24] sm:$0xff]   ;;  %vm691_vm3 = vsmask.f32 7424  ;;  %s4781_s20 = scalar_lea.vmem %s5514_s1, %s4670_s7 }
  0x11   : > { %v4452_v9 = vld [vmem:[%s4678_s10] sm:$0xff]   ;;  %v4453_v10 = vld [vmem:[%s4678_s10 + $0x28] sm:$0xff]   ;;  %v4457_v16 = vld [vmem:[%s4678_s10 + $0x30] sm:$0xff]   ;;  %s4866_s26 = scalar_lea.vmem %s5515_s2, %s4670_s7  ;;  %s5448_s12 = scalar_lea.vmem %s5519_s6, %s4670_s7 }
  0x12   : > { %v4456_v15 = vld [vmem:[%s4678_s10 + $0x8] sm:$0xff]   ;;  %v4461_v20 = vld [vmem:[%s4678_s10 + $0x10] sm:$0xff]   ;;  %v4462_v22 = vld [vmem:[%s4678_s10 + $0x38] sm:$0xff]  }
  0x13   : > { %3999 = vmatpush3.bf16.msra.mxu0 %v4448_v3  ;;  %4416 = vmatpush3.bf16.msra.mxu1 %v4448_v3  ;;  %v4470_v23 = vld [vmem:[%s4678_s10] sm:$0xff]   ;;  %v4473_v25 = vld [vmem:[%s5516_s3 + $0x48] sm:$0xff]   ;;  %v4465_v28 = vld [vmem:[%s4678_s10 + $0x18] sm:$0xff]  }
  0x14   : > { %4000 = vmatprep.subr.bf16.mxu0 %v4597_v1  ;;  %4412 = vmatprep.subr.bf16.mxu1 %v4597_v1  ;;  %v4471_v26 = vld [vmem:[%s4678_s10 + $0x8] sm:$0xff]   ;;  %v695_v27 = vshll.u32 %v4470_v23, 16  ;;  %v4466_v29 = vld [vmem:[%s4678_s10 + $0x40] sm:$0x7f]   ;;  %v693_v30 = vshrl.u32 %v4470_v23, 16  ;;  %v4474_v33 = vld [vmem:[%s4678_s10 + $0x10] sm:$0xff]  }
  0x15   : > { %v700_v32 = vshll.u32 %v4471_v26, 16  ;;  %v4472_v36 = vld [vmem:[%s5516_s3 + $0x8c] ss:$0 sps:$4 sm:$0xff]   ;;  %v4469_v38 = vld [vmem:[%s4678_s10 + $0x20] sm:$0xff]   ;;  %v708_v39 = vshll.u32 %v4474_v33, 16  ;;  %v704_v41 = vshrl.u32 %v4471_v26, 16 }
  0x16   : > { %v697_v31 = vrot.slane %v695_v27, 1  ;;  %v4476_v37 = vld [vmem:[%s4678_s10 + $0x8] sm:$0xff]   ;;  %v4475_v42 = vld [vmem:[%s4678_s10] sm:$0xfe]   ;;  %v1414_v43 = vsel %vm491_vm0, %v4472_v36, 0  ;;  %v4478_v46 = vld [vmem:[%s4678_s10 + $0x18] sm:$0xff]  }
  0x17   : > { %4001 = vmatpush3.bf16.msra.mxu0 %v4449_v4  ;;  %4417 = vmatpush3.bf16.msra.mxu1 %v4449_v4  ;;  %v702_v35 = vrot.slane %v700_v32, 1  ;;  %v1054_v44 = vrot.slane %v4476_v37, 1  ;;  %v710_v45 = vrot.slane %v708_v39, 1  ;;  %v1053_v48 = vrot.slane %v4475_v42, 1  ;;  %v4480_v49 = vld [vmem:[%s5516_s3 + $0x84] sm:$0xff]   ;;  %v4479_v52 = vld [vmem:[%s4678_s10 + $0x10] sm:$0xff]  }
  0x18   : > { %4002 = vmatprep.subr.bf16.mxu0 %v4597_v1  ;;  %4413 = vmatprep.subr.bf16.mxu1 %v4597_v1  ;;  %v698_v34 = vor.u32 %v697_v31, %v693_v30  ;;  %v4477_v50 = vld [vmem:[%s5516_s3 + $0xb0] ss:$0 sps:$4 sm:$0xff]   ;;  %v716_v51 = vshll.u32 %v4478_v46, 16  ;;  %v712_v55 = vshrl.u32 %v4474_v33, 16  ;;  %v4484_v57 = vld [vmem:[%s5516_s3 + $0x7c] sm:$0xff]   ;;  %v1056_v59 = vrot.slane %v4479_v52, 1 }
  0x19   : > { %v706_v47 = vor.u32 %v704_v41, %v702_v35  ;;  %v1055_v54 = vsel %vm1052_vm4, %v1053_v48, %v1054_v44  ;;  %v1774_v56 = vsel %vm491_vm0, %v4477_v50, 0  ;;  %v4481_v60 = vld [vmem:[%s4678_s10 + $0x20] sm:$0xff]   ;;  %v4483_v61 = vld [vmem:[%s5516_s3 + $0xa8] sm:$0xff]   ;;  %v4490_v63 = vld [vmem:[%s5516_s3 + $0x74] sm:$0xff]  }
  0x1a   : > { %v703_v40 = vsel %vm691_vm3, %v698_v34, %v702_v35  ;;  %v718_v58 = vrot.slane %v716_v51, 1  ;;  %v714_v62 = vor.u32 %v712_v55, %v710_v45  ;;  %v724_v0 = vshll.u32 %v4481_v60, 16  ;;  %v4482_v2 = vld [vmem:[%s4678_s10 + $0x18] sm:$0xff]   ;;  %v4496_v7 = vld [vmem:[%s5516_s3 + $0x6c] sm:$0xff]   ;;  %v4494_v37 = vld [vmem:[%s4678_s10 + $0x40] sm:$0xff]  }
  0x1b   : > { %4003 = vmatpush3.bf16.msra.mxu0 %v4450_v5  ;;  %4418 = vmatpush3.bf16.msra.mxu1 %v4450_v5  ;;  %v711_v53 = vsel %vm691_vm3, %v706_v47, %v710_v45  ;;  %v1057_v4 = vsel %vm1052_vm4, %v1054_v44, %v1056_v59  ;;  %v720_v5 = vshrl.u32 %v4478_v46, 16  ;;  %v4488_v27 = vld [vmem:[%s4678_s10 + $0x28] sm:$0xff]   ;;  %v4492_v33 = vld [vmem:[%s4678_s10 + $0x30] sm:$0xff]   ;;  %v756_v41 = vshll.u32 %v4494_v37, 16  ;;  %v4495_v42 = vld [vmem:[%s4678_s10 + $0x38] sm:$0xff]  }
  0x1c   : > { %4004 = vmatprep.subr.bf16.mxu0 %v4597_v1  ;;  %4414 = vmatprep.subr.bf16.mxu1 %v4597_v1  ;;  %v719_v3 = vsel %vm691_vm3, %v714_v62, %v718_v58  ;;  %v726_v8 = vrot.slane %v724_v0, 1  ;;  %v1062_v31 = vrot.slane %v4488_v27, 1  ;;  %v1064_v39 = vrot.slane %v4492_v33, 1  ;;  %v4520_v27 = vld [vmem:[%s5516_s3 + $0xe0] sm:$0xff]  }
  0x1d   : > { %v758_v46 = vrot.slane %v756_v41, 1  ;;  %v1066_v47 = vrot.slane %v4495_v42, 1  ;;  %v760_v52 = vshrl.u32 %v4494_v37, 16  ;;  %v4519_v42 = vld [vmem:[%s4781_s20 + $0x30] sm:$0xff]  }
  0x1e   : > { %v1065_v44 = vsel %vm1052_vm4, %v1062_v31, %v1064_v39 }
  0x1f   : > { %4005 = vmatpush3.bf16.msra.mxu0 %v4451_v6  ;;  %4419 = vmatpush3.bf16.msra.mxu1 %v4451_v6  ;;  %v4489_v6 = vld [vmem:[%s5516_s3 + $0xa0] sm:$0xff]   ;;  %v1067_v51 = vsel %vm1052_vm4, %v1064_v39, %v1066_v47  ;;  %v762_v55 = vor.u32 %v760_v52, %v758_v46  ;;  %v1700_v52 = vshrl.u32 %v4519_v42, 16 }
  0x20   : > { %4042 = vmatprep.subr.bf16.mxu1 %v4597_v1  ;;  %4088 = vmatprep.subr.bf16.mxu0 %v4597_v1 }
  0x22   : > { %4007 = vmatmul.mubr.msk.bf16.vlgmr.msra.gmra.mxu0 %vm463_vm2, %v4452_v9  ;;  %4027 = vmatmul.mubr.msk.bf16.vlgmr.msra.gmra.mxu1 %vm463_vm2, %v4453_v10  ;;  %v1058_v9 = vrot.slane %v4482_v2, 1  ;;  %v4485_v10 = vld [vmem:[%s4678_s10 + $0x28] sm:$0xff]  }
  0x23   : > { %4043 = vmatpush3.bf16.msra.mxu1 %v818_v11  ;;  %4089 = vmatpush3.bf16.msra.mxu0 %v1125_v12  ;;  %v722_v11 = vor.u32 %v720_v5, %v718_v58  ;;  %v4493_v12 = vld [vmem:[%s5516_s3 + $0x98] sm:$0xff]   ;;  %v736_v23 = vshrl.u32 %v4485_v10, 16  ;;  %v4503_v58 = vld [vmem:[%s4781_s20 + $0x8] sm:$0xff]  }
  0x24   : > { %4010 = vmatprep.mubr.msk.bf16.mxu0 %vm4598_vm1, %v4597_v1  ;;  %4030 = vmatprep.mubr.msk.bf16.mxu1 %vm4598_vm1, %v4597_v1  ;;  %v4507_v5 = vld [vmem:[%s5516_s3 + $0xcc] sm:$0xff]  }
  0x25   : > { %4044 = vmatprep.subr.bf16.mxu1 %v4597_v1  ;;  %4090 = vmatprep.subr.bf16.mxu0 %v4597_v1 }
  0x27   : > { %4045 = vmatpush3.bf16.msra.mxu1 %v4458_v13  ;;  %4091 = vmatpush3.bf16.msra.mxu0 %v4459_v14  ;;  %v728_v13 = vshrl.u32 %v4481_v60, 16  ;;  %v732_v14 = vshll.u32 %v4485_v10, 16  ;;  %v4499_v60 = vld [vmem:[%s4781_s20] sm:$0xff]  }
  0x28   : > { %4046 = vmatprep.subr.bf16.mxu1 %v4597_v1  ;;  %4092 = vmatprep.subr.bf16.mxu0 %v4597_v1 }
  0x2a   : > { %4011 = vmatmul.mubr.msk.bf16.gmra.mxu0 %vm463_vm2, %v4456_v15  ;;  %4031 = vmatmul.mubr.msk.bf16.gmra.mxu1 %vm463_vm2, %v4457_v16  ;;  %v4486_v15 = vld [vmem:[%s4678_s10 + $0x20] sm:$0xff]   ;;  %v727_v16 = vsel %vm691_vm3, %v722_v11, %v726_v8 }
  0x2b   : > { %4047 = vmatpush3.bf16.msra.mxu1 %v4460_v17  ;;  %4014 = vmatprep.mubr.msk.bf16.mxu0 %vm4598_vm1, %v4597_v1  ;;  %v1059_v17 = vsel %vm1052_vm4, %v1056_v59, %v1058_v9  ;;  %v4500_v59 = vld [vmem:[%s5516_s3 + $0xd4] ss:$0 sps:$4 sm:$0xff]  }
  0x2c   : > { %4034 = vmatprep.mubr.msk.bf16.mxu1 %vm4598_vm1, %v4597_v1  ;;  %4093 = vmatpush3.bf16.msra.mxu0 %v4463_v18  ;;  %v4498_v18 = vld [vmem:[%s5516_s3 + $0x90] sm:$0xff]   ;;  %v2080_v0 = vsel %vm491_vm0, %v4500_v59, 0 }
  0x2d   : > { %4048 = vmatprep.subr.bf16.mxu1 %v4597_v1  ;;  %4094 = vmatprep.subr.bf16.mxu0 %v4597_v1 }
  0x2f   : > { %4049 = vmatpush3.bf16.msra.mxu1 %v4464_v19  ;;  %v730_v19 = vor.u32 %v728_v13, %v726_v8 }
  0x30   : > { %4050 = vmatprep.subr.bf16.mxu1 %v4597_v1  ;;  %4095 = vmatpush3.bf16.msra.mxu0 %v4468_v21  ;;  %v1060_v21 = vrot.slane %v4486_v15, 1  ;;  %v4509_v15 = vld [vmem:[%s4781_s20 + $0x18] sm:$0xff]  }
  0x31   : > { %4096 = vmatprep.subr.bf16.mxu0 %v4597_v1 }
  0x32   : > { %4015 = vmatmul.mubr.msk.bf16.gmra.mxu0 %vm463_vm2, %v4461_v20  ;;  %4035 = vmatmul.mubr.msk.bf16.gmra.mxu1 %vm463_vm2, %v4462_v22  ;;  %v734_v20 = vrot.slane %v732_v14, 1  ;;  %v4487_v22 = vld [vmem:[%s4678_s10 + $0x30] sm:$0xff]   ;;  %v1063_v35 = vsel %vm1052_vm4, %v1060_v21, %v1062_v31 }
  0x33   : > { %4018 = vmatprep.mubr.msk.bf16.mxu0 %vm4598_vm1, %v4597_v1  ;;  %4038 = vmatprep.mubr.msk.bf16.mxu1 %vm4598_vm1, %v4597_v1  ;;  %v740_v26 = vshll.u32 %v4487_v22, 16  ;;  %v744_v36 = vshrl.u32 %v4487_v22, 16  ;;  %v4516_v22 = vld [vmem:[%s5516_s3 + $0xe8] sm:$0xff]  }
  0x34   : > { %4051 = vmatpush3.bf16.msra.mxu1 %v4467_v24  ;;  %4097 = vmatpush3.bf16.msra.mxu0 %v4473_v25  ;;  %v735_v24 = vsel %vm691_vm3, %v730_v19, %v734_v20  ;;  %v1061_v25 = vsel %vm1052_vm4, %v1058_v9, %v1060_v21  ;;  %v1660_v9 = vshrl.u32 %v4503_v58, 16  ;;  %v1672_v21 = vshll.u32 %v4509_v15, 16 }
  0x35   : > { %4134 = vmatprep.subr.bf16.mxu1 %v4597_v1  ;;  %4180 = vmatprep.subr.bf16.mxu0 %v4597_v1  ;;  %v742_v30 = vrot.slane %v740_v26, 1  ;;  %v4513_v26 = vld [vmem:[%s4781_s20 + $0x20] sm:$0xff]  }
  0x36   : > { %v1680_v31 = vshll.u32 %v4513_v26, 16 }
  0x3a   : > { %4019 = vmatmul.mubr.msk.bf16.gmra.mxu0 %vm463_vm2, %v4465_v28  ;;  %4039 = vmatmul.mubr.msk.bf16.gmra.mxu1 %vm463_vm2, %v4466_v29  ;;  %v4491_v28 = vld [vmem:[%s4678_s10 + $0x38] sm:$0xff]   ;;  %v738_v29 = vor.u32 %v736_v23, %v734_v20 }
  0x3b   : > { %4022 = vmatprep.mubr.msk.bf16.mxu0 %vm4598_vm1, %v4597_v1  ;;  %4052 = vmatprep.mubr.msk.bf16.mxu1 %vm4598_vm1, %v4597_v1  ;;  %v748_v32 = vshll.u32 %v4491_v28, 16  ;;  %v752_v45 = vshrl.u32 %v4491_v28, 16  ;;  %v4523_v23 = vld [vmem:[%s5516_s3 + $0xb4] sm:$0xff]  }
  0x3c   : > { %v743_v34 = vsel %vm691_vm3, %v738_v29, %v742_v30  ;;  %v4508_v28 = vld [vmem:[%s4781_s20 + $0x18] sm:$0xff]  }
  0x42   : > { %4023 = vmatmul.mubr.msk.bf16.gmra.mxu0 %vm463_vm2, %v4469_v38  ;;  %4053 = vmatmul.mubr.msk.bf16.vlgmr.msra.gmra.mxu1 %vm463_vm2, %v703_v40  ;;  %v750_v38 = vrot.slane %v748_v32, 1  ;;  %v746_v40 = vor.u32 %v744_v36, %v742_v30  ;;  %v1676_v30 = vshrl.u32 %v4509_v15, 16  ;;  %v4526_v32 = vld [vmem:[%s5516_s3 + $0xd8] sm:$0xff]   ;;  %v4512_v36 = vld [vmem:[%s4781_s20 + $0x20] sm:$0xff]  }
  0x43   : > { %4135 = vmatpush3.bf16.msra.mxu1 %v1414_v43  ;;  %4056 = vmatprep.mubr.msk.bf16.mxu1 %vm4598_vm1, %v4597_v1  ;;  %v4531_v15 = vld [vmem:[%s4866_s26] sm:$0xff]  }
  0x44   : > { %4098 = vmatprep.mubr.msk.bf16.mxu0 %vm4598_vm1, %v4597_v1  ;;  %4136 = vmatprep.subr.bf16.mxu1 %v4597_v1  ;;  %v751_v43 = vsel %vm691_vm3, %v746_v40, %v750_v38  ;;  %v754_v48 = vor.u32 %v752_v45, %v750_v38  ;;  %v1684_v38 = vshrl.u32 %v4513_v26, 16  ;;  %v4544_v26 = vld [vmem:[%s5516_s3 + $0x130] sm:$0xff]  }
  0x46   : > { %v759_v50 = vsel %vm691_vm3, %v754_v48, %v758_v46  ;;  %v1696_v46 = vshll.u32 %v4519_v42, 16 }
  0x47   : > { %4137 = vmatpush3.bf16.msra.mxu1 %v4480_v49  ;;  %v4497_v49 = vld [vmem:[%s4678_s10 + $0x40] sm:$0xff]  }
  0x48   : > { %4138 = vmatprep.subr.bf16.mxu1 %v4597_v1  ;;  %v1698_v48 = vrot.slane %v1696_v46, 1 }
  0x4a   : > { %4057 = vmatmul.mubr.msk.bf16.gmra.mxu1 %vm463_vm2, %v711_v53  ;;  %4099 = vmatmul.mubr.msk.bf16.vlgmr.msra.gmra.mxu0 %vm463_vm2, %v1055_v54  ;;  %v1068_v53 = vrot.slane %v4497_v49, 1  ;;  %v4502_v54 = vld [vmem:[%s4781_s20] sm:$0xff]   ;;  %v4522_v49 = vld [vmem:[%s4781_s20 + $0x38] sm:$0xff]  }
  0x4b   : > { %4181 = vmatpush3.bf16.msra.mxu0 %v1774_v56  ;;  %4060 = vmatprep.mubr.msk.bf16.mxu1 %vm4598_vm1, %v4597_v1  ;;  %v1708_v59 = vshrl.u32 %v4522_v49, 16 }
  0x4c   : > { %4102 = vmatprep.mubr.msk.bf16.mxu0 %vm4598_vm1, %v4597_v1  ;;  %4182 = vmatprep.subr.bf16.mxu0 %v4597_v1  ;;  %v1069_v56 = vsel %vm1052_vm4, %v1066_v47, %v1068_v53 }
  0x4d   : > { %4139 = vmatpush3.bf16.msra.mxu1 %v4484_v57  ;;  %v1651_v57 = vshll.u32 %v4502_v54, 16 }
  0x4e   : > { %4140 = vmatprep.subr.bf16.mxu1 %v4597_v1 }
  0x4f   : > { %4183 = vmatpush3.bf16.msra.mxu0 %v4483_v61  ;;  %v1649_v61 = vshrl.u32 %v4502_v54, 16  ;;  %v1653_v62 = vrot.slane %v1651_v57, 1  ;;  %v1702_v54 = vor.u32 %v1700_v52, %v1698_v48  ;;  %v4521_v57 = vld [vmem:[%s4781_s20 + $0x38] sm:$0xff]  }
  0x50   : > { %4184 = vmatprep.subr.bf16.mxu0 %v4597_v1 }
  0x51   : > { %4141 = vmatpush3.bf16.msra.mxu1 %v4490_v63  ;;  %v1656_v63 = vshll.u32 %v4503_v58, 16  ;;  %v1654_v2 = vor.u32 %v1653_v62, %v1649_v61 }
  0x52   : > { %4061 = vmatmul.mubr.msk.bf16.gmra.mxu1 %vm463_vm2, %v719_v3  ;;  %4103 = vmatmul.mubr.msk.bf16.gmra.mxu0 %vm463_vm2, %v1057_v4  ;;  %v4506_v4 = vld [vmem:[%s4781_s20 + $0x10] sm:$0xff]  }
  0x53   : > { %4064 = vmatprep.mubr.msk.bf16.mxu1 %vm4598_vm1, %v4597_v1  ;;  %4106 = vmatprep.mubr.msk.bf16.mxu0 %vm4598_vm1, %v4597_v1  ;;  %v1658_v3 = vrot.slane %v1656_v63, 1  ;;  %v1664_v10 = vshll.u32 %v4506_v4, 16  ;;  %v1668_v20 = vshrl.u32 %v4506_v4, 16  ;;  %v4524_v63 = vld [vmem:[%s4781_s20 + $0x40] sm:$0x7f]  }
  0x54   : > { %4185 = vmatpush3.bf16.msra.mxu0 %v4489_v6  ;;  %4142 = vmatprep.subr.bf16.mxu1 %v4597_v1  ;;  %v4504_v6 = vld [vmem:[%s5516_s3 + $0xf8] ss:$0 sps:$4 sm:$0xff]  }
  0x55   : > { %4186 = vmatprep.subr.bf16.mxu0 %v4597_v1  ;;  %4143 = vmatpush3.bf16.msra.mxu1 %v4496_v7  ;;  %v4501_v7 = vld [vmem:[%s4781_s20 + $0x8] sm:$0xff]   ;;  %v1659_v8 = vsel %vm691_vm3, %v1654_v2, %v1658_v3  ;;  %v2369_v11 = vsel %vm491_vm0, %v4504_v6, 0  ;;  %v1662_v13 = vor.u32 %v1660_v9, %v1658_v3  ;;  %v1666_v14 = vrot.slane %v1664_v10, 1  ;;  %v4527_v2 = vld [vmem:[%s4781_s20] sm:$0xfe]   ;;  %v4530_v10 = vld [vmem:[%s4781_s20 + $0x10] sm:$0xff]  }
  0x56   : > { %4226 = vmatprep.subr.bf16.mxu1 %v4597_v1  ;;  %v4528_v3 = vld [vmem:[%s4781_s20 + $0x8] sm:$0xff]  }
  0x57   : > { %v1667_v19 = vsel %vm691_vm3, %v1662_v13, %v1666_v14  ;;  %v2009_v6 = vrot.slane %v4528_v3, 1  ;;  %v4535_v13 = vld [vmem:[%s5516_s3 + $0x114] sm:$0xff]  }
  0x58   : > { %4187 = vmatpush3.bf16.msra.mxu0 %v4493_v12  ;;  %v4511_v12 = vld [vmem:[%s5516_s3 + $0xc4] sm:$0xff]  }
  0x59   : > { %4188 = vmatprep.subr.bf16.mxu0 %v4597_v1 }
  0x5a   : > { %4065 = vmatmul.mubr.msk.bf16.gmra.mxu1 %vm463_vm2, %v727_v16  ;;  %4107 = vmatmul.mubr.msk.bf16.gmra.mxu0 %vm463_vm2, %v1059_v17  ;;  %v4510_v16 = vld [vmem:[%s5516_s3 + $0xf0] sm:$0xff]   ;;  %v4517_v17 = vld [vmem:[%s5516_s3 + $0xbc] sm:$0xff]  }
  0x5b   : > { %4068 = vmatprep.mubr.msk.bf16.mxu1 %vm4598_vm1, %v4597_v1  ;;  %4110 = vmatprep.mubr.msk.bf16.mxu0 %vm4598_vm1, %v4597_v1 }
  0x5c   : > { %4189 = vmatpush3.bf16.msra.mxu0 %v4498_v18  ;;  %v4505_v18 = vld [vmem:[%s4781_s20 + $0x10] sm:$0xff]  }
  0x5d   : > { %4272 = vmatprep.subr.bf16.mxu0 %v4597_v1 }
  0x62   : > { %4069 = vmatmul.mubr.msk.bf16.gmra.mxu1 %vm463_vm2, %v735_v24  ;;  %4111 = vmatmul.mubr.msk.bf16.gmra.mxu0 %vm463_vm2, %v1061_v25  ;;  %v1670_v24 = vor.u32 %v1668_v20, %v1666_v14  ;;  %v1674_v25 = vrot.slane %v1672_v21, 1  ;;  %v4532_v14 = vld [vmem:[%s5516_s3 + $0x140] ss:$0 sps:$4 sm:$0xff]   ;;  %v4538_v21 = vld [vmem:[%s5516_s3 + $0x138] sm:$0xff]  }
  0x63   : > { %4072 = vmatprep.mubr.msk.bf16.mxu1 %vm4598_vm1, %v4597_v1  ;;  %4114 = vmatprep.mubr.msk.bf16.mxu0 %vm4598_vm1, %v4597_v1 }
  0x64   : > { %v1675_v29 = vsel %vm691_vm3, %v1670_v24, %v1674_v25  ;;  %v1678_v33 = vor.u32 %v1676_v30, %v1674_v25  ;;  %v4536_v25 = vld [vmem:[%s4781_s20 + $0x20] sm:$0xff]  }
  0x65   : > { %v2015_v30 = vrot.slane %v4536_v25, 1 }
  0x6a   : > { %4073 = vmatmul.mubr.msk.bf16.gmra.mxu1 %vm463_vm2, %v743_v34  ;;  %4115 = vmatmul.mubr.msk.bf16.gmra.mxu0 %vm463_vm2, %v1063_v35  ;;  %v1682_v34 = vrot.slane %v1680_v31, 1  ;;  %v4515_v35 = vld [vmem:[%s4781_s20 + $0x28] sm:$0xff]  }
  0x6b   : > { %4076 = vmatprep.mubr.msk.bf16.mxu1 %vm4598_vm1, %v4597_v1  ;;  %4118 = vmatprep.mubr.msk.bf16.mxu0 %vm4598_vm1, %v4597_v1  ;;  %v1688_v39 = vshll.u32 %v4515_v35, 16  ;;  %v1692_v45 = vshrl.u32 %v4515_v35, 16 }
  0x6c   : > { %v1683_v37 = vsel %vm691_vm3, %v1678_v33, %v1682_v34  ;;  %v1686_v40 = vor.u32 %v1684_v38, %v1682_v34  ;;  %v4548_v33 = vld [vmem:[%s5516_s3 + $0x128] sm:$0xff]  }
  0x6d   : > { %v1690_v41 = vrot.slane %v1688_v39, 1  ;;  %v4540_v38 = vld [vmem:[%s4781_s20 + $0x28] sm:$0xff]  }
  0x6f   : > { %v1694_v47 = vor.u32 %v1692_v45, %v1690_v41 }
  0x72   : > { %4077 = vmatmul.mubr.msk.bf16.gmra.mxu1 %vm463_vm2, %v751_v43  ;;  %4119 = vmatmul.mubr.msk.bf16.gmra.mxu0 %vm463_vm2, %v1065_v44  ;;  %v4514_v43 = vld [vmem:[%s4781_s20 + $0x28] sm:$0xff]   ;;  %v1691_v44 = vsel %vm691_vm3, %v1686_v40, %v1690_v41  ;;  %v4553_v41 = vld [vmem:[%s5516_s3 + $0x120] sm:$0xff]  }
  0x73   : > { %4080 = vmatprep.mubr.msk.bf16.mxu1 %vm4598_vm1, %v4597_v1  ;;  %4122 = vmatprep.mubr.msk.bf16.mxu0 %vm4598_vm1, %v4597_v1 }
  0x7a   : > { %4081 = vmatmul.mubr.msk.bf16.gmra.mxu1 %vm463_vm2, %v759_v50  ;;  %4123 = vmatmul.mubr.msk.bf16.gmra.mxu0 %vm463_vm2, %v1067_v51  ;;  %v4518_v50 = vld [vmem:[%s4781_s20 + $0x30] sm:$0xff]   ;;  %v1699_v51 = vsel %vm691_vm3, %v1694_v47, %v1698_v48 }
  0x7b   : > { %4084 = vmatprep.mubr.msk.bf16.mxu1 %vm4598_vm1, %v4597_v1  ;;  %4126 = vmatprep.mubr.msk.bf16.mxu0 %vm4598_vm1, %v4597_v1 }
  0x82   : > { %4085 = vmatmul.mubr.msk.bf16.gmra.mxu1 %vm463_vm2, %v762_v55  ;;  %4127 = vmatmul.mubr.msk.bf16.gmra.mxu0 %vm463_vm2, %v1069_v56  ;;  %v4525_v56 = vld [vmem:[%s4781_s20 + $0x40] sm:$0xff]  }
  0x83   : > { %4130 = vmatprep.mubr.msk.bf16.mxu0 %vm4598_vm1, %v4597_v1  ;;  %4144 = vmatprep.mubr.msk.bf16.mxu1 %vm4598_vm1, %v4597_v1  ;;  %v1716_v4 = vshrl.u32 %v4525_v56, 16 }
  0x8a   : > { %4131 = vmatmul.mubr.msk.bf16.gmra.mxu0 %vm463_vm2, %v1068_v53  ;;  %4145 = vmatmul.mubr.msk.bf16.vlgmr.msra.gmra.mxu1 %vm463_vm2, %v4499_v60  ;;  %v1704_v53 = vshll.u32 %v4522_v49, 16  ;;  %v1712_v60 = vshll.u32 %v4525_v56, 16  ;;  %v4541_v49 = vld [vmem:[%s4866_s26 + $0x18] sm:$0xff]  }
  0x8b   : > { %4227 = vmatpush3.bf16.msra.mxu1 %v2080_v0  ;;  %4148 = vmatprep.mubr.msk.bf16.mxu1 %vm4598_vm1, %v4597_v1 }
  0x8c   : > { %4190 = vmatprep.mubr.msk.bf16.mxu0 %vm4598_vm1, %v4597_v1  ;;  %4228 = vmatprep.subr.bf16.mxu1 %v4597_v1  ;;  %v1706_v55 = vrot.slane %v1704_v53, 1  ;;  %v1714_v62 = vrot.slane %v1712_v60, 1 }
  0x8e   : > { %v1707_v58 = vsel %vm691_vm3, %v1702_v54, %v1706_v55  ;;  %v1710_v61 = vor.u32 %v1708_v59, %v1706_v55 }
  0x8f   : > { %4229 = vmatpush3.bf16.msra.mxu1 %v4507_v5  ;;  %v2008_v5 = vrot.slane %v4527_v2, 1 }
  0x90   : > { %4230 = vmatprep.subr.bf16.mxu1 %v4597_v1  ;;  %v1715_v0 = vsel %vm691_vm3, %v1710_v61, %v1714_v62  ;;  %v4543_v61 = vld [vmem:[%s4866_s26 + $0x20] sm:$0xff]  }
  0x91   : > { %v2010_v9 = vsel %vm1052_vm4, %v2008_v5, %v2009_v6 }
  0x92   : > { %4149 = vmatmul.mubr.msk.bf16.gmra.mxu1 %vm463_vm2, %v4501_v7  ;;  %4191 = vmatmul.mubr.msk.bf16.vlgmr.msra.gmra.mxu0 %vm463_vm2, %v1659_v8  ;;  %v4529_v7 = vld [vmem:[%s5516_s3 + $0x11c] ss:$0 sps:$4 sm:$0xff]   ;;  %v1718_v8 = vor.u32 %v1716_v4, %v1714_v62 }
  0x93   : > { %4273 = vmatpush3.bf16.msra.mxu0 %v2369_v11  ;;  %4152 = vmatprep.mubr.msk.bf16.mxu1 %vm4598_vm1, %v4597_v1  ;;  %v2729_v11 = vsel %vm491_vm0, %v4529_v7, 0 }
  0x94   : > { %4194 = vmatprep.mubr.msk.bf16.mxu0 %vm4598_vm1, %v4597_v1  ;;  %4274 = vmatprep.subr.bf16.mxu0 %v4597_v1 }
  0x95   : > { %4231 = vmatpush3.bf16.msra.mxu1 %v4511_v12  ;;  %v2011_v12 = vrot.slane %v4530_v10, 1  ;;  %v4547_v10 = vld [vmem:[%s4866_s26 + $0x28] sm:$0xff]  }
  0x96   : > { %4232 = vmatprep.subr.bf16.mxu1 %v4597_v1 }
  0x97   : > { %4275 = vmatpush3.bf16.msra.mxu0 %v4510_v16  ;;  %v2012_v16 = vsel %vm1052_vm4, %v2009_v6, %v2011_v12 }
  0x98   : > { %4276 = vmatprep.subr.bf16.mxu0 %v4597_v1 }
  0x99   : > { %4233 = vmatpush3.bf16.msra.mxu1 %v4517_v17  ;;  %v4533_v17 = vld [vmem:[%s4781_s20 + $0x18] sm:$0xff]  }
  0x9a   : > { %4153 = vmatmul.mubr.msk.bf16.gmra.mxu1 %vm463_vm2, %v4505_v18  ;;  %4195 = vmatmul.mubr.msk.bf16.gmra.mxu0 %vm463_vm2, %v1667_v19  ;;  %v3035_v18 = vsel %vm491_vm0, %v4532_v14, 0  ;;  %v4539_v19 = vld [vmem:[%s5516_s3 + $0x10c] sm:$0xff]   ;;  %v2013_v20 = vrot.slane %v4533_v17, 1 }
  0x9b   : > { %4156 = vmatprep.mubr.msk.bf16.mxu1 %vm4598_vm1, %v4597_v1  ;;  %4198 = vmatprep.mubr.msk.bf16.mxu0 %vm4598_vm1, %v4597_v1 }
  0x9c   : > { %4277 = vmatpush3.bf16.msra.mxu0 %v4516_v22  ;;  %4234 = vmatprep.subr.bf16.mxu1 %v4597_v1  ;;  %v4545_v22 = vld [vmem:[%s5516_s3 + $0x104] sm:$0xff]   ;;  %v2014_v24 = vsel %vm1052_vm4, %v2011_v12, %v2013_v20 }
  0x9d   : > { %4278 = vmatprep.subr.bf16.mxu0 %v4597_v1  ;;  %4235 = vmatpush3.bf16.msra.mxu1 %v4523_v23  ;;  %v4534_v23 = vld [vmem:[%s4866_s26 + $0x8] sm:$0xff]   ;;  %v4549_v12 = vld [vmem:[%s4781_s20 + $0x40] sm:$0xff]  }
  0x9e   : > { %4318 = vmatprep.subr.bf16.mxu1 %v4597_v1 }
  0xa0   : > { %4279 = vmatpush3.bf16.msra.mxu0 %v4520_v27  ;;  %v4551_v27 = vld [vmem:[%s5516_s3 + $0xfc] sm:$0xff]  }
  0xa1   : > { %4280 = vmatprep.subr.bf16.mxu0 %v4597_v1 }
  0xa2   : > { %4157 = vmatmul.mubr.msk.bf16.gmra.mxu1 %vm463_vm2, %v4508_v28  ;;  %4199 = vmatmul.mubr.msk.bf16.gmra.mxu0 %vm463_vm2, %v1675_v29 }
  0xa3   : > { %4160 = vmatprep.mubr.msk.bf16.mxu1 %vm4598_vm1, %v4597_v1  ;;  %4202 = vmatprep.mubr.msk.bf16.mxu0 %vm4598_vm1, %v4597_v1 }
  0xa4   : > { %4281 = vmatpush3.bf16.msra.mxu0 %v4526_v32 }
  0xa5   : > { %4364 = vmatprep.subr.bf16.mxu0 %v4597_v1 }
  0xaa   : > { %4161 = vmatmul.mubr.msk.bf16.gmra.mxu1 %vm463_vm2, %v4512_v36  ;;  %4203 = vmatmul.mubr.msk.bf16.gmra.mxu0 %vm463_vm2, %v1683_v37  ;;  %v4537_v36 = vld [vmem:[%s4866_s26 + $0x10] sm:$0xff]   ;;  %v2016_v37 = vsel %vm1052_vm4, %v2013_v20, %v2015_v30 }
  0xab   : > { %4164 = vmatprep.mubr.msk.bf16.mxu1 %vm4598_vm1, %v4597_v1  ;;  %4206 = vmatprep.mubr.msk.bf16.mxu0 %vm4598_vm1, %v4597_v1 }
  0xb2   : > { %4165 = vmatmul.mubr.msk.bf16.gmra.mxu1 %vm463_vm2, %v4514_v43  ;;  %4207 = vmatmul.mubr.msk.bf16.gmra.mxu0 %vm463_vm2, %v1691_v44  ;;  %v2017_v44 = vrot.slane %v4540_v38, 1 }
  0xb3   : > { %4168 = vmatprep.mubr.msk.bf16.mxu1 %vm4598_vm1, %v4597_v1  ;;  %4210 = vmatprep.mubr.msk.bf16.mxu0 %vm4598_vm1, %v4597_v1 }
  0xba   : > { %4169 = vmatmul.mubr.msk.bf16.gmra.mxu1 %vm463_vm2, %v4518_v50  ;;  %4211 = vmatmul.mubr.msk.bf16.gmra.mxu0 %vm463_vm2, %v1699_v51  ;;  %v2018_v50 = vsel %vm1052_vm4, %v2015_v30, %v2017_v44  ;;  %v4542_v51 = vld [vmem:[%s4781_s20 + $0x30] sm:$0xff]  }
  0xbb   : > { %4172 = vmatprep.mubr.msk.bf16.mxu1 %vm4598_vm1, %v4597_v1  ;;  %4214 = vmatprep.mubr.msk.bf16.mxu0 %vm4598_vm1, %v4597_v1  ;;  %v2019_v56 = vrot.slane %v4542_v51, 1 }
  0xbd   : > { %v2020_v62 = vsel %vm1052_vm4, %v2017_v44, %v2019_v56 }
  0xc2   : > { %4173 = vmatmul.mubr.msk.bf16.gmra.mxu1 %vm463_vm2, %v4521_v57  ;;  %4215 = vmatmul.mubr.msk.bf16.gmra.mxu0 %vm463_vm2, %v1707_v58 }
  0xc3   : > { %4176 = vmatprep.mubr.msk.bf16.mxu1 %vm4598_vm1, %v4597_v1  ;;  %4218 = vmatprep.mubr.msk.bf16.mxu0 %vm4598_vm1, %v4597_v1 }
  0xca   : > { %4177 = vmatmul.mubr.msk.bf16.gmra.mxu1 %vm463_vm2, %v4524_v63  ;;  %4219 = vmatmul.mubr.msk.bf16.gmra.mxu0 %vm463_vm2, %v1715_v0  ;;  %v4546_v63 = vld [vmem:[%s4781_s20 + $0x38] sm:$0xff]  }
  0xcb   : > { %4222 = vmatprep.mubr.msk.bf16.mxu0 %vm4598_vm1, %v4597_v1  ;;  %4236 = vmatprep.mubr.msk.bf16.mxu1 %vm4598_vm1, %v4597_v1  ;;  %v2021_v5 = vrot.slane %v4546_v63, 1 }
  0xd2   : > { %4223 = vmatmul.mubr.msk.bf16.gmra.mxu0 %vm463_vm2, %v1718_v8  ;;  %4237 = vmatmul.mubr.msk.bf16.vlgmr.msra.gmra.mxu1 %vm463_vm2, %v2010_v9 }
  0xd3   : > { %4319 = vmatpush3.bf16.msra.mxu1 %v2729_v11  ;;  %4240 = vmatprep.mubr.msk.bf16.mxu1 %vm4598_vm1, %v4597_v1  ;;  %v2022_v11 = vsel %vm1052_vm4, %v2019_v56, %v2021_v5  ;;  %v4557_v56 = vld [vmem:[%s4866_s26 + $0x10] sm:$0xff]  }
  0xd4   : > { %4282 = vmatprep.mubr.msk.bf16.mxu0 %vm4598_vm1, %v4597_v1  ;;  %4320 = vmatprep.subr.bf16.mxu1 %v4597_v1 }
  0xd7   : > { %4321 = vmatpush3.bf16.msra.mxu1 %v4535_v13 }
  0xd8   : > { %4322 = vmatprep.subr.bf16.mxu1 %v4597_v1 }
  0xda   : > { %4241 = vmatmul.mubr.msk.bf16.gmra.mxu1 %vm463_vm2, %v2012_v16  ;;  %4283 = vmatmul.mubr.msk.bf16.vlgmr.msra.gmra.mxu0 %vm463_vm2, %v4531_v15 }
  0xdb   : > { %4365 = vmatpush3.bf16.msra.mxu0 %v3035_v18  ;;  %4244 = vmatprep.mubr.msk.bf16.mxu1 %vm4598_vm1, %v4597_v1  ;;  %v2023_v18 = vrot.slane %v4549_v12, 1  ;;  %v4559_v12 = vld [vmem:[%s4866_s26 + $0x8] sm:$0xff]  }
  0xdc   : > { %4286 = vmatprep.mubr.msk.bf16.mxu0 %vm4598_vm1, %v4597_v1  ;;  %4366 = vmatprep.subr.bf16.mxu0 %v4597_v1 }
  0xdd   : > { %4323 = vmatpush3.bf16.msra.mxu1 %v4539_v19  ;;  %v2024_v25 = vsel %vm1052_vm4, %v2021_v5, %v2023_v18  ;;  %v4554_v5 = vld [vmem:[%s4866_s26 + $0x40] sm:$0x7f]  }
  0xde   : > { %4324 = vmatprep.subr.bf16.mxu1 %v4597_v1 }
  0xdf   : > { %4367 = vmatpush3.bf16.msra.mxu0 %v4538_v21 }
  0xe0   : > { %4368 = vmatprep.subr.bf16.mxu0 %v4597_v1 }
  0xe1   : > { %4325 = vmatpush3.bf16.msra.mxu1 %v4545_v22 }
  0xe2   : > { %v5084_v28 = vpop.f32.mrf.mxu0  ;;  %v5086_v29 = vpop.f32.mrf.mxu1  ;;  %4245 = vmatmul.mubr.msk.bf16.gmra.mxu1 %vm463_vm2, %v2014_v24  ;;  %4287 = vmatmul.mubr.msk.bf16.gmra.mxu0 %vm463_vm2, %v4534_v23  ;;  %v4550_v23 = vld [vmem:[%s4866_s26 + $0x30] sm:$0xff]  }
  0xe3   : > { %4248 = vmatprep.mubr.msk.bf16.mxu1 %vm4598_vm1, %v4597_v1  ;;  %4290 = vmatprep.mubr.msk.bf16.mxu0 %vm4598_vm1, %v4597_v1 }
  0xe4   : > { %v4008_v31 = vpop.f32.mrf.mxu0  ;;  %v4028_v32 = vpop.f32.mrf.mxu1  ;;  %4369 = vmatpush3.bf16.msra.mxu0 %v4544_v26  ;;  %4326 = vmatprep.subr.bf16.mxu1 %v4597_v1  ;;  %v4555_v26 = vld [vmem:[%s4866_s26] sm:$0xff]  }
  0xe5   : > { %4370 = vmatprep.subr.bf16.mxu0 %v4597_v1  ;;  %4327 = vmatpush3.bf16.msra.mxu1 %v4551_v27  ;;  %v2604_v44 = vshrl.u32 %v4555_v26, 16 }
  0xe6   : > { %v5099_v34 = vpop.f32.mrf.mxu0  ;;  %v5101_v35 = vpop.f32.mrf.mxu1 }
  0xe8   : > { %v4009_v39 = vpop.f32.mrf.mxu0  ;;  %v4029_v40 = vpop.f32.mrf.mxu1  ;;  %4371 = vmatpush3.bf16.msra.mxu0 %v4548_v33 }
  0xe9   : > { %4372 = vmatprep.subr.bf16.mxu0 %v4597_v1 }
  0xea   : > { %v5110_v42 = vpop.f32.mrf.mxu0  ;;  %v5112_v43 = vpop.f32.mrf.mxu1  ;;  %4249 = vmatmul.mubr.msk.bf16.gmra.mxu1 %vm463_vm2, %v2016_v37  ;;  %4291 = vmatmul.mubr.msk.bf16.gmra.mxu0 %vm463_vm2, %v4537_v36  ;;  %v2606_v36 = vshll.u32 %v4555_v26, 16 }
  0xeb   : > { %4252 = vmatprep.mubr.msk.bf16.mxu1 %vm4598_vm1, %v4597_v1  ;;  %4294 = vmatprep.mubr.msk.bf16.mxu0 %vm4598_vm1, %v4597_v1 }
  0xec   : > { %v4012_v45 = vpop.f32.mrf.mxu0  ;;  %v4032_v46 = vpop.f32.mrf.mxu1  ;;  %4373 = vmatpush3.bf16.msra.mxu0 %v4553_v41  ;;  %v4552_v41 = vld [vmem:[%s4866_s26 + $0x38] sm:$0xff]  }
  0xed   : > { %v2608_v46 = vrot.slane %v2606_v36, 1 }
  0xee   : > { %v5120_v47 = vpop.f32.mrf.mxu0  ;;  %v5122_v48 = vpop.f32.mrf.mxu1 }
  0xf0   : > { %v4013_v52 = vpop.f32.mrf.mxu0  ;;  %v4033_v53 = vpop.f32.mrf.mxu1 }
  0xf2   : > { %v5127_v54 = vpop.f32.mrf.mxu0  ;;  %v5129_v55 = vpop.f32.mrf.mxu1  ;;  %4253 = vmatmul.mubr.msk.bf16.gmra.mxu1 %vm463_vm2, %v2018_v50  ;;  %4295 = vmatmul.mubr.msk.bf16.gmra.mxu0 %vm463_vm2, %v4541_v49 }
  0xf3   : > { %4256 = vmatprep.mubr.msk.bf16.mxu1 %vm4598_vm1, %v4597_v1  ;;  %4298 = vmatprep.mubr.msk.bf16.mxu0 %vm4598_vm1, %v4597_v1 }
  0xf4   : > { %v4016_v57 = vpop.f32.mrf.mxu0  ;;  %v4036_v58 = vpop.f32.mrf.mxu1 }
  0xf6   : > { %v5137_v59 = vpop.f32.mrf.mxu0  ;;  %v5139_v60 = vpop.f32.mrf.mxu1 }
  0xf8   : > { %v4017_v0 = vpop.f32.mrf.mxu0  ;;  %v4037_v2 = vpop.f32.mrf.mxu1 }
  0xfa   : > { %v5144_v3 = vpop.f32.mrf.mxu0  ;;  %v5146_v4 = vpop.f32.mrf.mxu1  ;;  %4257 = vmatmul.mubr.msk.bf16.gmra.mxu1 %vm463_vm2, %v2020_v62  ;;  %4299 = vmatmul.mubr.msk.bf16.gmra.mxu0 %vm463_vm2, %v4543_v61 }
  0xfb   : > { %4260 = vmatprep.mubr.msk.bf16.mxu1 %vm4598_vm1, %v4597_v1  ;;  %4302 = vmatprep.mubr.msk.bf16.mxu0 %vm4598_vm1, %v4597_v1 }
  0xfc   : > { %v4020_v6 = vpop.f32.mrf.mxu0  ;;  %v4040_v7 = vpop.f32.mrf.mxu1 }
  0xfe   : > { %v5154_v8 = vpop.f32.mrf.mxu0  ;;  %v596_v9 = vpop.f32.mrf.mxu1 }
  0xff   : > { %617 = vst [vmem:[#allocation2 + $0x60] sm:$0x3f] %v596_v9 }
 0x100   : > { %v4021_v13 = vpop.f32.mrf.mxu0  ;;  %v4041_v14 = vpop.f32.mrf.mxu1 }
 0x102   : > { %v5159_v15 = vpop.f32.mrf.mxu0  ;;  %v854_v16 = vpop.f32.mrf.mxu1  ;;  %4261 = vmatmul.mubr.msk.bf16.gmra.mxu1 %vm463_vm2, %v2022_v11  ;;  %4303 = vmatmul.mubr.msk.bf16.gmra.mxu0 %vm463_vm2, %v4547_v10  ;;  %v4558_v11 = vld [vmem:[%s4866_s26] sm:$0xfe]  }
 0x103   : > { %v943_v17 = vadd.f32 %v854_v16, %v5084_v28  ;;  %4264 = vmatprep.mubr.msk.bf16.mxu1 %vm4598_vm1, %v4597_v1  ;;  %4306 = vmatprep.mubr.msk.bf16.mxu0 %vm4598_vm1, %v4597_v1 }
 0x104   : > { %v4024_v19 = vpop.f32.mrf.mxu0  ;;  %v4054_v20 = vpop.f32.mrf.mxu1 }
 0x105   : > { %v4560_v20 = vld [vmem:[%s4866_s26 + $0x18] sm:$0xff]  }
 0x106   : > { %v5168_v21 = vpop.f32.mrf.mxu0  ;;  %v857_v22 = vpop.f32.mrf.mxu1 }
 0x107   : > { %v944_v24 = vadd.f32 %v857_v22, %v5099_v34  ;;  %v4556_v34 = vld [vmem:[%s4866_s26 + $0x8] sm:$0xff]  }
 0x108   : > { %v4025_v27 = vpop.f32.mrf.mxu0  ;;  %v4055_v28 = vpop.f32.mrf.mxu1  ;;  %v2611_v49 = vshll.u32 %v4556_v34, 16  ;;  %v2615_v6 = vshrl.u32 %v4556_v34, 16 }
 0x10a   : > { %v862_v30 = vpop.f32.mrf.mxu1  ;;  %v1161_v31 = vpop.f32.mrf.mxu0  ;;  %4265 = vmatmul.mubr.msk.bf16.gmra.mxu1 %vm463_vm2, %v2024_v25  ;;  %4307 = vmatmul.mubr.msk.bf16.gmra.mxu0 %vm463_vm2, %v4550_v23  ;;  %v2613_v61 = vrot.slane %v2611_v49, 1  ;;  %v2963_v23 = vrot.slane %v4558_v11, 1 }
 0x10b   : > { %v945_v32 = vadd.f32 %v862_v30, %v5110_v42  ;;  %v5177_v33 = vadd.f32 %v1161_v31, %v943_v17  ;;  %4268 = vmatprep.mubr.msk.bf16.mxu1 %vm4598_vm1, %v4597_v1  ;;  %4310 = vmatprep.mubr.msk.bf16.mxu0 %vm4598_vm1, %v4597_v1  ;;  %v2623_v30 = vshrl.u32 %v4557_v56, 16  ;;  %v2627_v31 = vshll.u32 %v4560_v20, 16 }
 0x10c   : > { %v4058_v37 = vpop.f32.mrf.mxu1  ;;  %v4100_v38 = vpop.f32.mrf.mxu0 }
 0x10e   : > { %v865_v39 = vpop.f32.mrf.mxu1  ;;  %v1164_v40 = vpop.f32.mrf.mxu0 }
 0x10f   : > { %v946_v45 = vadd.f32 %v865_v39, %v5120_v47  ;;  %v5186_v42 = vadd.f32 %v1164_v40, %v944_v24  ;;  %v2609_v47 = vor.u32 %v2608_v46, %v2604_v44  ;;  %v2964_v24 = vrot.slane %v4559_v12, 1 }
 0x110   : > { %v4059_v50 = vpop.f32.mrf.mxu1  ;;  %v4101_v51 = vpop.f32.mrf.mxu0 }
 0x111   : > { %v2614_v10 = vsel %vm691_vm3, %v2609_v47, %v2613_v61  ;;  %v2965_v37 = vsel %vm1052_vm4, %v2963_v23, %v2964_v24  ;;  %v4562_v50 = vld [vmem:[%s4866_s26 + $0x20] sm:$0xff]  }
 0x112   : > { %v870_v52 = vpop.f32.mrf.mxu1  ;;  %v1169_v53 = vpop.f32.mrf.mxu0  ;;  %4269 = vmatmul.mubr.msk.bf16.gmra.mxu1 %vm463_vm2, %v2023_v18  ;;  %4311 = vmatmul.mubr.msk.bf16.gmra.mxu0 %vm463_vm2, %v4552_v41  ;;  %v2617_v18 = vor.u32 %v2615_v6, %v2613_v61 }
 0x113   : > { %v947_v57 = vadd.f32 %v870_v52, %v5127_v54  ;;  %v5192_v58 = vadd.f32 %v1169_v53, %v945_v32  ;;  %4314 = vmatprep.mubr.msk.bf16.mxu0 %vm4598_vm1, %v4597_v1  ;;  %4328 = vmatprep.mubr.msk.bf16.mxu1 %vm4598_vm1, %v4597_v1  ;;  %v2619_v54 = vshll.u32 %v4557_v56, 16  ;;  %v4561_v32 = vld [vmem:[%s4866_s26 + $0x10] sm:$0xff]  }
 0x114   : > { %v4062_v62 = vpop.f32.mrf.mxu1  ;;  %v4104_v63 = vpop.f32.mrf.mxu0  ;;  %v2966_v46 = vrot.slane %v4561_v32, 1 }
 0x115   : > { %v2621_v19 = vrot.slane %v2619_v54, 1  ;;  %v2631_v62 = vshrl.u32 %v4560_v20, 16  ;;  %v2635_v63 = vshll.u32 %v4562_v50, 16 }
 0x116   : > { %v873_v0 = vpop.f32.mrf.mxu1  ;;  %v1172_v2 = vpop.f32.mrf.mxu0  ;;  %v2967_v47 = vsel %vm1052_vm4, %v2964_v24, %v2966_v46  ;;  %v4565_v24 = vld [vmem:[%s4866_s26 + $0x20] sm:$0xff]  }
 0x117   : > { %v948_v7 = vadd.f32 %v873_v0, %v5137_v59  ;;  %v5200_v9 = vadd.f32 %v1172_v2, %v946_v45  ;;  %v2622_v36 = vsel %vm691_vm3, %v2617_v18, %v2621_v19  ;;  %v2625_v44 = vor.u32 %v2623_v30, %v2621_v19  ;;  %v4563_v0 = vld [vmem:[%s4866_s26 + $0x18] sm:$0xff]  }
 0x118   : > { %v4063_v13 = vpop.f32.mrf.mxu1  ;;  %v4105_v14 = vpop.f32.mrf.mxu0  ;;  %v2629_v45 = vrot.slane %v2627_v31, 1  ;;  %v2637_v11 = vrot.slane %v2635_v63, 1  ;;  %v2968_v12 = vrot.slane %v4563_v0, 1  ;;  %v2639_v18 = vshrl.u32 %v4562_v50, 16 }
 0x11a   : > { %v878_v16 = vpop.f32.mrf.mxu1  ;;  %v1177_v17 = vpop.f32.mrf.mxu0  ;;  %4315 = vmatmul.mubr.msk.bf16.gmra.mxu0 %vm463_vm2, %v4554_v5  ;;  %4329 = vmatmul.mubr.msk.bf16.vlgmr.msra.gmra.mxu1 %vm463_vm2, %v2614_v10  ;;  %v2969_v23 = vsel %vm1052_vm4, %v2966_v46, %v2968_v12  ;;  %v2641_v31 = vor.u32 %v2639_v18, %v2637_v11 }
 0x11b   : > { %v949_v59 = vadd.f32 %v878_v16, %v5144_v3  ;;  %v5209_v22 = vadd.f32 %v1177_v17, %v947_v57  ;;  %4332 = vmatprep.mubr.msk.bf16.mxu1 %vm4598_vm1, %v4597_v1  ;;  %4374 = vmatprep.mubr.msk.bf16.mxu0 %vm4598_vm1, %v4597_v1  ;;  %v2630_v57 = vsel %vm691_vm3, %v2625_v44, %v2629_v45 }
 0x11c   : > { %v4066_v25 = vpop.f32.mrf.mxu1  ;;  %v4108_v26 = vpop.f32.mrf.mxu0 }
 0x11e   : > { %v881_v27 = vpop.f32.mrf.mxu1  ;;  %v1180_v28 = vpop.f32.mrf.mxu0 }
 0x11f   : > { %v950_v34 = vadd.f32 %v881_v27, %v5154_v8  ;;  %v5217_v3 = vadd.f32 %v1180_v28, %v948_v7  ;;  %v4564_v7 = vld [vmem:[%s4866_s26 + $0x28] sm:$0xff]  }
 0x120   : > { %v4067_v38 = vpop.f32.mrf.mxu1  ;;  %v4109_v39 = vpop.f32.mrf.mxu0  ;;  %v2643_v19 = vshll.u32 %v4564_v7, 16 }
 0x122   : > { %v886_v40 = vpop.f32.mrf.mxu1  ;;  %v1185_v41 = vpop.f32.mrf.mxu0  ;;  %4333 = vmatmul.mubr.msk.bf16.gmra.mxu1 %vm463_vm2, %v2622_v36  ;;  %4375 = vmatmul.mubr.msk.bf16.vlgmr.msra.gmra.mxu0 %vm463_vm2, %v2965_v37  ;;  %v2645_v32 = vrot.slane %v2643_v19, 1  ;;  %v2970_v36 = vrot.slane %v4565_v24, 1  ;;  %v4566_v37 = vld [vmem:[%s4866_s26 + $0x30] sm:$0xff]  }
 0x123   : > { %v951_v8 = vadd.f32 %v886_v40, %v5159_v15  ;;  %v5224_v49 = vadd.f32 %v1185_v41, %v949_v59  ;;  %4336 = vmatprep.mubr.msk.bf16.mxu1 %vm4598_vm1, %v4597_v1  ;;  %4378 = vmatprep.mubr.msk.bf16.mxu0 %vm4598_vm1, %v4597_v1  ;;  %v2651_v50 = vshll.u32 %v4566_v37, 16 }
 0x124   : > { %v4070_v51 = vpop.f32.mrf.mxu1  ;;  %v4112_v52 = vpop.f32.mrf.mxu0  ;;  %v2646_v44 = vsel %vm691_vm3, %v2641_v31, %v2645_v32  ;;  %v2971_v46 = vsel %vm1052_vm4, %v2968_v12, %v2970_v36  ;;  %v942_v31 = vld [vmem:[#allocation2 + $0x60] sm:$0x3f] }
 0x125   : > { %v4567_v51 = vld [vmem:[%s4866_s26 + $0x28] sm:$0xff]   ;;  %v2653_v63 = vrot.slane %v2651_v50, 1 }
 0x126   : > { %v889_v53 = vpop.f32.mrf.mxu1  ;;  %v1188_v56 = vpop.f32.mrf.mxu0  ;;  %v2972_v0 = vrot.slane %v4567_v51, 1 }
 0x127   : > { %v952_v15 = vadd.f32 %v889_v53, %v5168_v21  ;;  %v5234_v61 = vadd.f32 %v1188_v56, %v950_v34  ;;  %v2633_v21 = vor.u32 %v2631_v62, %v2629_v45 }
 0x128   : > { %v4071_v2 = vpop.f32.mrf.mxu1  ;;  %v4113_v5 = vpop.f32.mrf.mxu0 }
 0x129   : > { %v2638_v59 = vsel %vm691_vm3, %v2633_v21, %v2637_v11 }
 0x12a   : > { %v894_v6 = vpop.f32.mrf.mxu1  ;;  %v1193_v54 = vpop.f32.mrf.mxu0  ;;  %4337 = vmatmul.mubr.msk.bf16.gmra.mxu1 %vm463_vm2, %v2630_v57  ;;  %4379 = vmatmul.mubr.msk.bf16.gmra.mxu0 %vm463_vm2, %v2967_v47 }
 0x12b   : > { %v5240_v10 = vadd.f32 %v1193_v54, %v951_v8  ;;  %4340 = vmatprep.mubr.msk.bf16.mxu1 %vm4598_vm1, %v4597_v1  ;;  %4382 = vmatprep.mubr.msk.bf16.mxu0 %vm4598_vm1, %v4597_v1  ;;  %v953_v27 = vadd.f32 %v894_v6, %v5086_v29  ;;  %v2647_v8 = vshrl.u32 %v4564_v7, 16  ;;  %v2655_v7 = vshrl.u32 %v4566_v37, 16 }
 0x12c   : > { %v4074_v13 = vpop.f32.mrf.mxu1  ;;  %v4116_v14 = vpop.f32.mrf.mxu0 }
 0x12d   : > { %v2649_v62 = vor.u32 %v2647_v8, %v2645_v32  ;;  %v2973_v13 = vsel %vm1052_vm4, %v2970_v36, %v2972_v0  ;;  %v4569_v14 = vld [vmem:[%s4866_s26 + $0x30] sm:$0xff]  }
 0x12e   : > { %v897_v16 = vpop.f32.mrf.mxu1  ;;  %v1196_v17 = vpop.f32.mrf.mxu0 }
 0x12f   : > { %v5246_v20 = vadd.f32 %v1196_v17, %v952_v15  ;;  %v954_v39 = vadd.f32 %v897_v16, %v5101_v35  ;;  %v4568_v35 = vld [vmem:[%s4866_s26 + $0x38] sm:$0xff]   ;;  %v2654_v12 = vsel %vm691_vm3, %v2649_v62, %v2653_v63 }
 0x130   : > { %v4075_v25 = vpop.f32.mrf.mxu1  ;;  %v4117_v26 = vpop.f32.mrf.mxu0  ;;  %v2659_v21 = vshll.u32 %v4568_v35, 16  ;;  %v2663_v37 = vshrl.u32 %v4568_v35, 16 }
 0x131   : > { %v2974_v25 = vrot.slane %v4569_v14, 1  ;;  %v4570_v26 = vld [vmem:[%s4866_s26 + $0x40] sm:$0xff]  }
 0x132   : > { %v902_v28 = vpop.f32.mrf.mxu1  ;;  %v1201_v30 = vpop.f32.mrf.mxu0  ;;  %4341 = vmatmul.mubr.msk.bf16.gmra.mxu1 %vm463_vm2, %v2638_v59  ;;  %4383 = vmatmul.mubr.msk.bf16.gmra.mxu0 %vm463_vm2, %v2969_v23  ;;  %v2661_v23 = vrot.slane %v2659_v21, 1 }
 0x133   : > { %v5254_v34 = vadd.f32 %v1201_v30, %v953_v27  ;;  %4344 = vmatprep.mubr.msk.bf16.mxu1 %vm4598_vm1, %v4597_v1  ;;  %4386 = vmatprep.mubr.msk.bf16.mxu0 %vm4598_vm1, %v4597_v1  ;;  %v955_v56 = vadd.f32 %v902_v28, %v5112_v43 }
 0x134   : > { %v4078_v29 = vpop.f32.mrf.mxu1  ;;  %v4120_v38 = vpop.f32.mrf.mxu0  ;;  %v2665_v51 = vor.u32 %v2663_v37, %v2661_v23 }
 0x136   : > { %v905_v40 = vpop.f32.mrf.mxu1  ;;  %v1204_v41 = vpop.f32.mrf.mxu0 }
 0x137   : > { %v5263_v45 = vadd.f32 %v1204_v41, %v954_v39  ;;  %v956_v5 = vadd.f32 %v905_v40, %v5122_v48  ;;  %v2657_v48 = vor.u32 %v2655_v7, %v2653_v63  ;;  %v2975_v39 = vsel %vm1052_vm4, %v2972_v0, %v2974_v25  ;;  %v4571_v41 = vld [vmem:[%s4866_s26 + $0x38] sm:$0xff]  }
 0x138   : > { %v4079_v52 = vpop.f32.mrf.mxu1  ;;  %v4121_v53 = vpop.f32.mrf.mxu0  ;;  %v2667_v40 = vshll.u32 %v4570_v26, 16 }
 0x139   : > { %v2662_v36 = vsel %vm691_vm3, %v2657_v48, %v2661_v23 }
 0x13a   : > { %v910_v57 = vpop.f32.mrf.mxu1  ;;  %v1209_v47 = vpop.f32.mrf.mxu0  ;;  %4345 = vmatmul.mubr.msk.bf16.gmra.mxu1 %vm463_vm2, %v2646_v44  ;;  %4387 = vmatmul.mubr.msk.bf16.gmra.mxu0 %vm463_vm2, %v2971_v46 }
 0x13b   : > { %v5271_v15 = vadd.f32 %v1209_v47, %v955_v56  ;;  %4348 = vmatprep.mubr.msk.bf16.mxu1 %vm4598_vm1, %v4597_v1  ;;  %4390 = vmatprep.mubr.msk.bf16.mxu0 %vm4598_vm1, %v4597_v1  ;;  %v957_v18 = vadd.f32 %v910_v57, %v5129_v55  ;;  %v2976_v56 = vrot.slane %v4571_v41, 1 }
 0x13c   : > { %v4082_v43 = vpop.f32.mrf.mxu1  ;;  %v4124_v2 = vpop.f32.mrf.mxu0 }
 0x13d   : > { %v2977_v43 = vsel %vm1052_vm4, %v2974_v25, %v2976_v56  ;;  %v4572_v2 = vld [vmem:[%s4866_s26 + $0x40] sm:$0xff]  }
 0x13e   : > { %v913_v6 = vpop.f32.mrf.mxu1  ;;  %v1212_v54 = vpop.f32.mrf.mxu0  ;;  %v2978_v14 = vrot.slane %v4572_v2, 1 }
 0x13f   : > { %v5278_v11 = vadd.f32 %v1212_v54, %v956_v5  ;;  %v958_v28 = vadd.f32 %v913_v6, %v5139_v60 }
 0x140   : > { %v4083_v16 = vpop.f32.mrf.mxu1  ;;  %v4125_v17 = vpop.f32.mrf.mxu0 }
 0x142   : > { %v918_v19 = vpop.f32.mrf.mxu1  ;;  %v1217_v59 = vpop.f32.mrf.mxu0  ;;  %4349 = vmatmul.mubr.msk.bf16.gmra.mxu1 %vm463_vm2, %v2654_v12  ;;  %4391 = vmatmul.mubr.msk.bf16.gmra.mxu0 %vm463_vm2, %v2973_v13  ;;  %v2671_v12 = vshrl.u32 %v4570_v26, 16 }
 0x143   : > { %v5286_v24 = vadd.f32 %v1217_v59, %v957_v18  ;;  %4352 = vmatprep.mubr.msk.bf16.mxu1 %vm4598_vm1, %v4597_v1  ;;  %4394 = vmatprep.mubr.msk.bf16.mxu0 %vm4598_vm1, %v4597_v1  ;;  %v959_v8 = vadd.f32 %v918_v19, %v5146_v4  ;;  %v2669_v4 = vrot.slane %v2667_v40, 1 }
 0x144   : > { %v4086_v55 = vpop.f32.mrf.mxu1  ;;  %v4128_v27 = vpop.f32.mrf.mxu0 }
 0x145   : > { %v2670_v0 = vsel %vm691_vm3, %v2665_v51, %v2669_v4  ;;  %v2673_v59 = vor.u32 %v2671_v12, %v2669_v4 }
 0x146   : > { %v921_v30 = vpop.f32.mrf.mxu1  ;;  %v1220_v32 = vpop.f32.mrf.mxu0 }
 0x147   : > { %v960_v29 = vadd.f32 %v942_v31, %v921_v30  ;;  %v5295_v38 = vadd.f32 %v1220_v32, %v958_v28 }
 0x148   : > { %v4087_v44 = vpop.f32.mrf.mxu1  ;;  %v4129_v46 = vpop.f32.mrf.mxu0 }
 0x149   : > { %978 = vst [vmem:[#allocation2 + $0x60] sm:$0x3f] %v960_v29 }
 0x14a   : > { %v1225_v50 = vpop.f32.mrf.mxu0  ;;  %v1450_v60 = vpop.f32.mrf.mxu1  ;;  %4353 = vmatmul.mubr.msk.bf16.gmra.mxu1 %vm463_vm2, %v2662_v36  ;;  %4395 = vmatmul.mubr.msk.bf16.gmra.mxu0 %vm463_vm2, %v2975_v39 }
 0x14b   : > { %v5302_v52 = vadd.f32 %v1225_v50, %v959_v8  ;;  %v1539_v53 = vadd.f32 %v1450_v60, %v5177_v33  ;;  %4356 = vmatprep.mubr.msk.bf16.mxu1 %vm4598_vm1, %v4597_v1  ;;  %4398 = vmatprep.mubr.msk.bf16.mxu0 %vm4598_vm1, %v4597_v1 }
 0x14c   : > { %v4132_v57 = vpop.f32.mrf.mxu0  ;;  %v4146_v47 = vpop.f32.mrf.mxu1 }
 0x14e   : > { %v1228_v35 = vpop.f32.mrf.mxu0  ;;  %v1453_v62 = vpop.f32.mrf.mxu1 }
 0x14f   : > { %v1540_v63 = vadd.f32 %v1453_v62, %v5186_v42 }
 0x150   : > { %v1249_v33 = vld [vmem:[#allocation2 + $0x60] sm:$0x3f]  ;;  %v4133_v5 = vpop.f32.mrf.mxu0  ;;  %v4147_v6 = vpop.f32.mrf.mxu1 }
 0x151   : > { %v1267_v54 = vadd.f32 %v1249_v33, %v1228_v35 }
 0x152   : > { %v1458_v7 = vpop.f32.mrf.mxu1  ;;  %v1810_v21 = vpop.f32.mrf.mxu0  ;;  %4357 = vmatmul.mubr.msk.bf16.gmra.mxu1 %vm463_vm2, %v2670_v0  ;;  %4399 = vmatmul.mubr.msk.bf16.gmra.mxu0 %vm463_vm2, %v2977_v43 }
 0x153   : > { %1285 = vst [vmem:[#allocation2 + $0x60] sm:$0x3f] %v1267_v54  ;;  %v1541_v13 = vadd.f32 %v1458_v7, %v5192_v58  ;;  %v5316_v42 = vadd.f32 %v1810_v21, %v1539_v53  ;;  %4360 = vmatprep.mubr.msk.bf16.mxu1 %vm4598_vm1, %v4597_v1  ;;  %4402 = vmatprep.mubr.msk.bf16.mxu0 %vm4598_vm1, %v4597_v1 }
 0x154   : > { %v4150_v16 = vpop.f32.mrf.mxu1  ;;  %v4192_v17 = vpop.f32.mrf.mxu0  ;;  %v2979_v58 = vsel %vm1052_vm4, %v2976_v56, %v2978_v14 }
 0x156   : > { %v1461_v18 = vpop.f32.mrf.mxu1  ;;  %v1813_v19 = vpop.f32.mrf.mxu0 }
 0x157   : > { %v1542_v48 = vadd.f32 %v1461_v18, %v5200_v9  ;;  %v5323_v23 = vadd.f32 %v1813_v19, %v1540_v63 }
 0x158   : > { %v4151_v25 = vpop.f32.mrf.mxu1  ;;  %v4193_v26 = vpop.f32.mrf.mxu0 }
 0x15a   : > { %v1466_v55 = vpop.f32.mrf.mxu1  ;;  %v1818_v27 = vpop.f32.mrf.mxu0  ;;  %4361 = vmatmul.mubr.msk.bf16.gmra.mxu1 %vm463_vm2, %v2673_v59  ;;  %4403 = vmatmul.mubr.msk.bf16.gmra.mxu0 %vm463_vm2, %v2979_v58 }
 0x15b   : > { %v1543_v28 = vadd.f32 %v1466_v55, %v5209_v22  ;;  %v5329_v30 = vadd.f32 %v1818_v27, %v1541_v13  ;;  %4406 = vmatprep.mubr.msk.bf16.mxu0 %vm4598_vm1, %v4597_v1 }
 0x15c   : > { %v4154_v9 = vpop.f32.mrf.mxu1  ;;  %v4196_v31 = vpop.f32.mrf.mxu0 }
 0x15e   : > { %v1469_v32 = vpop.f32.mrf.mxu1  ;;  %v1821_v36 = vpop.f32.mrf.mxu0 }
 0x15f   : > { %v1544_v37 = vadd.f32 %v1469_v32, %v5217_v3  ;;  %v5334_v29 = vadd.f32 %v1821_v36, %v1542_v48 }
 0x160   : > { %v4155_v39 = vpop.f32.mrf.mxu1  ;;  %v4197_v40 = vpop.f32.mrf.mxu0 }
 0x162   : > { %v1474_v41 = vpop.f32.mrf.mxu1  ;;  %v1826_v44 = vpop.f32.mrf.mxu0  ;;  %4407 = vmatmul.mubr.msk.bf16.gmra.mxu0 %vm463_vm2, %v2978_v14 }
 0x163   : > { %v1545_v22 = vadd.f32 %v1474_v41, %v5224_v49  ;;  %v5338_v46 = vadd.f32 %v1826_v44, %v1543_v28 }
 0x164   : > { %v4158_v8 = vpop.f32.mrf.mxu1  ;;  %v4200_v1 = vpop.f32.mrf.mxu0 }
 0x166   : > { %v1477_v50 = vpop.f32.mrf.mxu1  ;;  %v1829_v60 = vpop.f32.mrf.mxu0 }
 0x167   : > { %v1546_v51 = vadd.f32 %v1477_v50, %v5234_v61  ;;  %v5341_v53 = vadd.f32 %v1829_v60, %v1544_v37 }
 0x168   : > { %v4159_v3 = vpop.f32.mrf.mxu1  ;;  %v4201_v4 = vpop.f32.mrf.mxu0 }
 0x169   : > { %v1538_v4 = vld [vmem:[#allocation2 + $0x60] sm:$0x3f] }
 0x16a   : > { %v1482_v56 = vpop.f32.mrf.mxu1  ;;  %v1834_v57 = vpop.f32.mrf.mxu0 }
 0x16b   : > { %v1547_v47 = vadd.f32 %v1482_v56, %v5240_v10  ;;  %v5344_v35 = vadd.f32 %v1834_v57, %v1545_v22 }
 0x16c   : > { %v4162_v62 = vpop.f32.mrf.mxu1  ;;  %v4204_v49 = vpop.f32.mrf.mxu0 }
 0x16e   : > { %v1485_v63 = vpop.f32.mrf.mxu1  ;;  %v1837_v0 = vpop.f32.mrf.mxu0 }
 0x16f   : > { %v1548_v43 = vadd.f32 %v1485_v63, %v5246_v20  ;;  %v5347_v2 = vadd.f32 %v1837_v0, %v1546_v51 }
 0x170   : > { %v4163_v33 = vpop.f32.mrf.mxu1  ;;  %v4205_v61 = vpop.f32.mrf.mxu0 }
 0x172   : > { %v1490_v5 = vpop.f32.mrf.mxu1  ;;  %v1842_v6 = vpop.f32.mrf.mxu0 }
 0x173   : > { %v1549_v54 = vadd.f32 %v1490_v5, %v5254_v34  ;;  %v5350_v7 = vadd.f32 %v1842_v6, %v1547_v47 }
 0x174   : > { %v4166_v21 = vpop.f32.mrf.mxu1  ;;  %v4208_v10 = vpop.f32.mrf.mxu0 }
 0x176   : > { %v1493_v12 = vpop.f32.mrf.mxu1  ;;  %v1845_v13 = vpop.f32.mrf.mxu0 }
 0x177   : > { %v1550_v14 = vadd.f32 %v1493_v12, %v5263_v45  ;;  %v5353_v16 = vadd.f32 %v1845_v13, %v1548_v43 }
 0x178   : > { %v4167_v17 = vpop.f32.mrf.mxu1  ;;  %v4209_v20 = vpop.f32.mrf.mxu0 }
 0x17a   : > { %v1498_v18 = vpop.f32.mrf.mxu1  ;;  %v1850_v19 = vpop.f32.mrf.mxu0 }
 0x17b   : > { %v1551_v59 = vadd.f32 %v1498_v18, %v5271_v15  ;;  %v5356_v48 = vadd.f32 %v1850_v19, %v1549_v54 }
 0x17c   : > { %v4170_v58 = vpop.f32.mrf.mxu1  ;;  %v4212_v34 = vpop.f32.mrf.mxu0 }
 0x17e   : > { %v1501_v25 = vpop.f32.mrf.mxu1  ;;  %v1853_v26 = vpop.f32.mrf.mxu0 }
 0x17f   : > { %v1552_v55 = vadd.f32 %v1501_v25, %v5278_v11  ;;  %v5359_v27 = vadd.f32 %v1853_v26, %v1550_v14 }
 0x180   : > { %v4171_v28 = vpop.f32.mrf.mxu1  ;;  %v4213_v45 = vpop.f32.mrf.mxu0 }
 0x182   : > { %v1506_v9 = vpop.f32.mrf.mxu1  ;;  %v1858_v31 = vpop.f32.mrf.mxu0 }
 0x183   : > { %v1553_v32 = vadd.f32 %v1506_v9, %v5286_v24  ;;  %v5362_v36 = vadd.f32 %v1858_v31, %v1551_v59 }
 0x184   : > { %v4174_v37 = vpop.f32.mrf.mxu1  ;;  %v4216_v15 = vpop.f32.mrf.mxu0 }
 0x186   : > { %v1509_v39 = vpop.f32.mrf.mxu1  ;;  %v1861_v40 = vpop.f32.mrf.mxu0 }
 0x187   : > { %v1554_v41 = vadd.f32 %v1509_v39, %v5295_v38  ;;  %v5365_v44 = vadd.f32 %v1861_v40, %v1552_v55 }
 0x188   : > { %v4175_v22 = vpop.f32.mrf.mxu1  ;;  %v4217_v11 = vpop.f32.mrf.mxu0 }
 0x18a   : > { %v1514_v8 = vpop.f32.mrf.mxu1  ;;  %v1866_v1 = vpop.f32.mrf.mxu0 }
 0x18b   : > { %v1555_v50 = vadd.f32 %v1514_v8, %v5302_v52  ;;  %v5368_v60 = vadd.f32 %v1866_v1, %v1553_v32 }
 0x18c   : > { %v4178_v51 = vpop.f32.mrf.mxu1  ;;  %v4220_v24 = vpop.f32.mrf.mxu0 }
 0x18e   : > { %v1517_v3 = vpop.f32.mrf.mxu1  ;;  %v1869_v56 = vpop.f32.mrf.mxu0 }
 0x18f   : > { %v1556_v57 = vadd.f32 %v1538_v4, %v1517_v3  ;;  %v5370_v47 = vadd.f32 %v1869_v56, %v1554_v41 }
 0x190   : > { %v4179_v62 = vpop.f32.mrf.mxu1  ;;  %v4221_v38 = vpop.f32.mrf.mxu0 }
 0x191   : > { %1574 = vst [vmem:[#allocation2 + $0x60] sm:$0x3f] %v1556_v57 }
 0x192   : > { %v1874_v49 = vpop.f32.mrf.mxu0  ;;  %v2116_v63 = vpop.f32.mrf.mxu1 }
 0x193   : > { %v5372_v0 = vadd.f32 %v1874_v49, %v1555_v50  ;;  %v2205_v43 = vadd.f32 %v2116_v63, %v5316_v42 }
 0x194   : > { %v4224_v52 = vpop.f32.mrf.mxu0  ;;  %v4238_v33 = vpop.f32.mrf.mxu1 }
 0x196   : > { %v1877_v61 = vpop.f32.mrf.mxu0  ;;  %v2119_v5 = vpop.f32.mrf.mxu1 }
 0x197   : > { %v2206_v6 = vadd.f32 %v2119_v5, %v5323_v23 }
 0x198   : > { %v1898_v54 = vld [vmem:[#allocation2 + $0x60] sm:$0x3f]  ;;  %v4225_v21 = vpop.f32.mrf.mxu0  ;;  %v4239_v10 = vpop.f32.mrf.mxu1 }
 0x199   : > { %v1916_v12 = vadd.f32 %v1898_v54, %v1877_v61 }
 0x19a   : > { %v2124_v13 = vpop.f32.mrf.mxu1  ;;  %v2405_v14 = vpop.f32.mrf.mxu0 }
 0x19b   : > { %1934 = vst [vmem:[#allocation2 + $0x60] sm:$0x3f] %v1916_v12  ;;  %v2207_v17 = vadd.f32 %v2124_v13, %v5329_v30  ;;  %v5377_v20 = vadd.f32 %v2405_v14, %v2205_v43 }
 0x19c   : > { %v4242_v18 = vpop.f32.mrf.mxu1  ;;  %v4284_v19 = vpop.f32.mrf.mxu0 }
 0x19e   : > { %v2127_v42 = vpop.f32.mrf.mxu1  ;;  %v2408_v59 = vpop.f32.mrf.mxu0 }
 0x19f   : > { %v2208_v58 = vadd.f32 %v2127_v42, %v5334_v29  ;;  %v5380_v34 = vadd.f32 %v2408_v59, %v2206_v6 }
 0x1a0   : > { %v4243_v23 = vpop.f32.mrf.mxu1  ;;  %v4285_v25 = vpop.f32.mrf.mxu0 }
 0x1a2   : > { %v2132_v26 = vpop.f32.mrf.mxu1  ;;  %v2413_v55 = vpop.f32.mrf.mxu0 }
 0x1a3   : > { %v2209_v28 = vadd.f32 %v2132_v26, %v5338_v46  ;;  %v5383_v45 = vadd.f32 %v2413_v55, %v2207_v17 }
 0x1a4   : > { %v4246_v9 = vpop.f32.mrf.mxu1  ;;  %v4288_v30 = vpop.f32.mrf.mxu0 }
 0x1a6   : > { %v2135_v31 = vpop.f32.mrf.mxu1  ;;  %v2416_v32 = vpop.f32.mrf.mxu0 }
 0x1a7   : > { %v2210_v37 = vadd.f32 %v2135_v31, %v5341_v53  ;;  %v5386_v15 = vadd.f32 %v2416_v32, %v2208_v58 }
 0x1a8   : > { %v4247_v39 = vpop.f32.mrf.mxu1  ;;  %v4289_v29 = vpop.f32.mrf.mxu0 }
 0x1aa   : > { %v2140_v40 = vpop.f32.mrf.mxu1  ;;  %v2421_v41 = vpop.f32.mrf.mxu0 }
 0x1ab   : > { %v2211_v22 = vadd.f32 %v2140_v40, %v5344_v35  ;;  %v5389_v11 = vadd.f32 %v2421_v41, %v2209_v28 }
 0x1ac   : > { %v4250_v8 = vpop.f32.mrf.mxu1  ;;  %v4292_v46 = vpop.f32.mrf.mxu0 }
 0x1ae   : > { %v2143_v1 = vpop.f32.mrf.mxu1  ;;  %v2424_v50 = vpop.f32.mrf.mxu0 }
 0x1af   : > { %v2212_v51 = vadd.f32 %v2143_v1, %v5347_v2  ;;  %v5392_v24 = vadd.f32 %v2424_v50, %v2210_v37 }
 0x1b0   : > { %v4251_v3 = vpop.f32.mrf.mxu1  ;;  %v4293_v53 = vpop.f32.mrf.mxu0 }
 0x1b1   : > { %v2204_v53 = vld [vmem:[#allocation2 + $0x60] sm:$0x3f] }
 0x1b2   : > { %v2148_v4 = vpop.f32.mrf.mxu1  ;;  %v2429_v56 = vpop.f32.mrf.mxu0 }
 0x1b3   : > { %v2213_v57 = vadd.f32 %v2148_v4, %v5350_v7  ;;  %v5395_v62 = vadd.f32 %v2429_v56, %v2211_v22 }
 0x1b4   : > { %v4254_v38 = vpop.f32.mrf.mxu1  ;;  %v4296_v35 = vpop.f32.mrf.mxu0 }
 0x1b6   : > { %v2151_v49 = vpop.f32.mrf.mxu1  ;;  %v2432_v63 = vpop.f32.mrf.mxu0 }
 0x1b7   : > { %v2214_v43 = vadd.f32 %v2151_v49, %v5353_v16  ;;  %v5398_v52 = vadd.f32 %v2432_v63, %v2212_v51 }
 0x1b8   : > { %v4255_v33 = vpop.f32.mrf.mxu1  ;;  %v4297_v2 = vpop.f32.mrf.mxu0 }
 0x1ba   : > { %v2156_v61 = vpop.f32.mrf.mxu1  ;;  %v2437_v5 = vpop.f32.mrf.mxu0 }
 0x1bb   : > { %v2215_v6 = vadd.f32 %v2156_v61, %v5356_v48  ;;  %v5401_v54 = vadd.f32 %v2437_v5, %v2213_v57 }
 0x1bc   : > { %v4258_v21 = vpop.f32.mrf.mxu1  ;;  %v4300_v7 = vpop.f32.mrf.mxu0 }
 0x1be   : > { %v2159_v10 = vpop.f32.mrf.mxu1  ;;  %v2440_v12 = vpop.f32.mrf.mxu0 }
 0x1bf   : > { %v2216_v13 = vadd.f32 %v2159_v10, %v5359_v27  ;;  %v5404_v14 = vadd.f32 %v2440_v12, %v2214_v43 }
 0x1c0   : > { %v4259_v17 = vpop.f32.mrf.mxu1  ;;  %v4301_v16 = vpop.f32.mrf.mxu0 }
 0x1c2   : > { %v2164_v18 = vpop.f32.mrf.mxu1  ;;  %v2445_v19 = vpop.f32.mrf.mxu0 }
 0x1c3   : > { %v2217_v42 = vadd.f32 %v2164_v18, %v5362_v36  ;;  %v5407_v59 = vadd.f32 %v2445_v19, %v2215_v6 }
 0x1c4   : > { %v4262_v58 = vpop.f32.mrf.mxu1  ;;  %v4304_v48 = vpop.f32.mrf.mxu0 }
 0x1c6   : > { %v2167_v23 = vpop.f32.mrf.mxu1  ;;  %v2448_v25 = vpop.f32.mrf.mxu0 }
 0x1c7   : > { %v2218_v26 = vadd.f32 %v2167_v23, %v5365_v44  ;;  %v5410_v55 = vadd.f32 %v2448_v25, %v2216_v13  ;;  %v5429_v13 = vld [vmem:[%s5517_s4] ss:$0 sm:$0xff] }
 0x1c8   : > { %v4263_v28 = vpop.f32.mrf.mxu1  ;;  %v4305_v27 = vpop.f32.mrf.mxu0 }
 0x1ca   : > { %v2172_v9 = vpop.f32.mrf.mxu1  ;;  %v2453_v30 = vpop.f32.mrf.mxu0 }
 0x1cb   : > { %v2219_v31 = vadd.f32 %v2172_v9, %v5368_v60  ;;  %v5413_v32 = vadd.f32 %v2453_v30, %v2217_v42 }
 0x1cc   : > { %v4266_v37 = vpop.f32.mrf.mxu1  ;;  %v4308_v36 = vpop.f32.mrf.mxu0 }
 0x1ce   : > { %v2175_v39 = vpop.f32.mrf.mxu1  ;;  %v2456_v29 = vpop.f32.mrf.mxu0 }
 0x1cf   : > { %v2220_v40 = vadd.f32 %v2175_v39, %v5370_v47  ;;  %v5416_v41 = vadd.f32 %v2456_v29, %v2218_v26 }
 0x1d0   : > { %v4267_v22 = vpop.f32.mrf.mxu1  ;;  %v4309_v44 = vpop.f32.mrf.mxu0 }
 0x1d2   : > { %v2180_v8 = vpop.f32.mrf.mxu1  ;;  %v2461_v46 = vpop.f32.mrf.mxu0 }
 0x1d3   : > { %v2221_v1 = vadd.f32 %v2180_v8, %v5372_v0  ;;  %v5419_v50 = vadd.f32 %v2461_v46, %v2219_v31 }
 0x1d4   : > { %v4270_v51 = vpop.f32.mrf.mxu1  ;;  %v4312_v60 = vpop.f32.mrf.mxu0 }
 0x1d6   : > { %v2183_v3 = vpop.f32.mrf.mxu1  ;;  %v2464_v4 = vpop.f32.mrf.mxu0 }
 0x1d7   : > { %v2222_v56 = vadd.f32 %v2204_v53, %v2183_v3  ;;  %v5421_v57 = vadd.f32 %v2464_v4, %v2220_v40 }
 0x1d8   : > { %v4271_v38 = vpop.f32.mrf.mxu1  ;;  %v4313_v47 = vpop.f32.mrf.mxu0 }
 0x1d9   : > { %2240 = vst [vmem:[#allocation2 + $0x60] sm:$0x3f] %v2222_v56 }
 0x1da   : > { %v2469_v35 = vpop.f32.mrf.mxu0  ;;  %v2765_v49 = vpop.f32.mrf.mxu1 }
 0x1db   : > { %v5423_v63 = vadd.f32 %v2469_v35, %v2221_v1  ;;  %v2854_v21 = vadd.f32 %v2765_v49, %v5377_v20  ;;  %v5436_v20 = vld [vmem:[%s5518_s5] ss:$0 sm:$0xff] }
 0x1dc   : > { %v4316_v43 = vpop.f32.mrf.mxu0  ;;  %v4330_v33 = vpop.f32.mrf.mxu1 }
 0x1de   : > { %v2472_v0 = vpop.f32.mrf.mxu0  ;;  %v2768_v2 = vpop.f32.mrf.mxu1 }
 0x1df   : > { %v2855_v19 = vadd.f32 %v2768_v2, %v5380_v34 }
 0x1e0   : > { %v2493_v61 = vld [vmem:[#allocation2 + $0x60] sm:$0x3f]  ;;  %v4317_v5 = vpop.f32.mrf.mxu0  ;;  %v4331_v6 = vpop.f32.mrf.mxu1 }
 0x1e1   : > { %v2511_v7 = vadd.f32 %v2493_v61, %v2472_v0 }
 0x1e2   : > { %v2773_v10 = vpop.f32.mrf.mxu1  ;;  %v3071_v12 = vpop.f32.mrf.mxu0 }
 0x1e3   : > { %2529 = vst [vmem:[#allocation2 + $0x60] sm:$0x3f] %v2511_v7  ;;  %v3160_v17 = vadd.f32 %v3071_v12, %v2854_v21  ;;  %v2856_v28 = vadd.f32 %v2773_v10, %v5383_v45 }
 0x1e4   : > { %v4334_v16 = vpop.f32.mrf.mxu1  ;;  %v4376_v18 = vpop.f32.mrf.mxu0 }
 0x1e5   : > { %v3221_v42 = vmul.f32 %v5429_v13, %v3160_v17 }
 0x1e6   : > { %v2776_v58 = vpop.f32.mrf.mxu1  ;;  %v3074_v48 = vpop.f32.mrf.mxu0 }
 0x1e7   : > { %v3161_v23 = vadd.f32 %v3074_v48, %v2855_v19  ;;  %v3246_v27 = vadd.f32 %v5436_v20, %v3221_v42  ;;  %v2857_v40 = vadd.f32 %v2776_v58, %v5386_v15 }
 0x1e8   : > { %v4335_v25 = vpop.f32.mrf.mxu1  ;;  %v4377_v26 = vpop.f32.mrf.mxu0 }
 0x1e9   : > { %v3222_v9 = vmul.f32 %v5429_v13, %v3161_v23  ;;  %v3264_v29 = vmax.f32 %v3246_v27, 0.0 }
 0x1ea   : > { %v2781_v34 = vpop.f32.mrf.mxu1  ;;  %v3079_v30 = vpop.f32.mrf.mxu0 }
 0x1eb   : > { %v3247_v31 = vadd.f32 %v5436_v20, %v3222_v9  ;;  %v3162_v37 = vadd.f32 %v3079_v30, %v2856_v28  ;;  %v2858_v3 = vadd.f32 %v2781_v34, %v5389_v11 }
 0x1ec   : > { %v4338_v36 = vpop.f32.mrf.mxu1  ;;  %v4380_v39 = vpop.f32.mrf.mxu0 }
 0x1ed   : > { %v3265_v22 = vmax.f32 %v3247_v31, 0.0  ;;  %v3223_v44 = vmul.f32 %v5429_v13, %v3162_v37 }
 0x1ee   : > { %v2784_v45 = vpop.f32.mrf.mxu1  ;;  %v3082_v8 = vpop.f32.mrf.mxu0 }
 0x1ef   : > { %v3826_v46 = vpack.c.bf16 %v3265_v22, %v3264_v29  ;;  %v3163_v1 = vadd.f32 %v3082_v8, %v2857_v40  ;;  %v3248_v15 = vadd.f32 %v5436_v20, %v3223_v44  ;;  %v2859_v33 = vadd.f32 %v2784_v45, %v5392_v24 }
 0x1f0   : > { %v4339_v51 = vpop.f32.mrf.mxu1  ;;  %v4381_v60 = vpop.f32.mrf.mxu0 }
 0x1f1   : > { %3827 = vst [vmem:[%s5448_s12] sm:$0xff] %v3826_v46   ;;  %v3224_v53 = vmul.f32 %v5429_v13, %v3163_v1  ;;  %v3266_v43 = vmax.f32 %v3248_v15, 0.0 }
 0x1f2   : > { %v2789_v4 = vpop.f32.mrf.mxu1  ;;  %v3087_v56 = vpop.f32.mrf.mxu0 }
 0x1f3   : > { %v3249_v38 = vadd.f32 %v5436_v20, %v3224_v53  ;;  %v3164_v47 = vadd.f32 %v3087_v56, %v2858_v3  ;;  %v2860_v10 = vadd.f32 %v2789_v4, %v5395_v62 }
 0x1f4   : > { %v4342_v35 = vpop.f32.mrf.mxu1  ;;  %v4384_v49 = vpop.f32.mrf.mxu0 }
 0x1f5   : > { %v3267_v0 = vmax.f32 %v3249_v38, 0.0  ;;  %v3225_v2 = vmul.f32 %v5429_v13, %v3164_v47 }
 0x1f6   : > { %v2792_v61 = vpop.f32.mrf.mxu1  ;;  %v3090_v11 = vpop.f32.mrf.mxu0 }
 0x1f7   : > { %v3831_v5 = vpack.c.bf16 %v3267_v0, %v3266_v43  ;;  %v3165_v6 = vadd.f32 %v3090_v11, %v2859_v33  ;;  %v3250_v12 = vadd.f32 %v5436_v20, %v3225_v2  ;;  %v2861_v23 = vadd.f32 %v2792_v61, %v5398_v52 }
 0x1f8   : > { %v4343_v21 = vpop.f32.mrf.mxu1  ;;  %v4385_v7 = vpop.f32.mrf.mxu0 }
 0x1f9   : > { %3863 = vst [vmem:[%s5448_s12 + $0x8] sm:$0xff] %v3831_v5   ;;  %v3226_v17 = vmul.f32 %v5429_v13, %v3165_v6  ;;  %v3268_v48 = vmax.f32 %v3250_v12, 0.0 }
 0x1fa   : > { %v2797_v16 = vpop.f32.mrf.mxu1  ;;  %v3095_v18 = vpop.f32.mrf.mxu0 }
 0x1fb   : > { %v3251_v24 = vadd.f32 %v5436_v20, %v3226_v17  ;;  %v3166_v19 = vadd.f32 %v3095_v18, %v2860_v10  ;;  %v2862_v31 = vadd.f32 %v2797_v16, %v5401_v54 }
 0x1fc   : > { %v4346_v42 = vpop.f32.mrf.mxu1  ;;  %v4388_v58 = vpop.f32.mrf.mxu0 }
 0x1fd   : > { %v3269_v25 = vmax.f32 %v3251_v24, 0.0  ;;  %v3227_v26 = vmul.f32 %v5429_v13, %v3166_v19 }
 0x1fe   : > { %v2800_v28 = vpop.f32.mrf.mxu1  ;;  %v3098_v62 = vpop.f32.mrf.mxu0 }
 0x1ff   : > { %v3836_v27 = vpack.c.bf16 %v3269_v25, %v3268_v48  ;;  %v3167_v9 = vadd.f32 %v3098_v62, %v2861_v23  ;;  %v3252_v37 = vadd.f32 %v5436_v20, %v3227_v26  ;;  %v2863_v8 = vadd.f32 %v2800_v28, %v5404_v14 }
 0x200   : > { %v4347_v34 = vpop.f32.mrf.mxu1  ;;  %v4389_v30 = vpop.f32.mrf.mxu0 }
 0x201   : > { %3864 = vst [vmem:[%s5448_s12 + $0x10] sm:$0xff] %v3836_v27   ;;  %v3228_v36 = vmul.f32 %v5429_v13, %v3167_v9  ;;  %v3270_v45 = vmax.f32 %v3252_v37, 0.0 }
 0x202   : > { %v2805_v39 = vpop.f32.mrf.mxu1  ;;  %v3103_v29 = vpop.f32.mrf.mxu0 }
 0x203   : > { %v3253_v52 = vadd.f32 %v5436_v20, %v3228_v36  ;;  %v3168_v40 = vadd.f32 %v3103_v29, %v2862_v31  ;;  %v2864_v4 = vadd.f32 %v2805_v39, %v5407_v59 }
 0x204   : > { %v4350_v22 = vpop.f32.mrf.mxu1  ;;  %v4392_v44 = vpop.f32.mrf.mxu0 }
 0x205   : > { %v3271_v46 = vmax.f32 %v3253_v52, 0.0  ;;  %v3229_v1 = vmul.f32 %v5429_v13, %v3168_v40 }
 0x206   : > { %v2808_v51 = vpop.f32.mrf.mxu1  ;;  %v3106_v54 = vpop.f32.mrf.mxu0 }
 0x207   : > { %v3841_v60 = vpack.c.bf16 %v3271_v46, %v3270_v45  ;;  %v3169_v3 = vadd.f32 %v3106_v54, %v2863_v8  ;;  %v3254_v56 = vadd.f32 %v5436_v20, %v3229_v1  ;;  %v2865_v2 = vadd.f32 %v2808_v51, %v5410_v55 }
 0x208   : > { %v4351_v15 = vpop.f32.mrf.mxu1  ;;  %v4393_v53 = vpop.f32.mrf.mxu0 }
 0x209   : > { %3865 = vst [vmem:[%s5448_s12 + $0x18] sm:$0xff] %v3841_v60   ;;  %v3230_v38 = vmul.f32 %v5429_v13, %v3169_v3  ;;  %v3272_v0 = vmax.f32 %v3254_v56, 0.0 }
 0x20a   : > { %v2813_v47 = vpop.f32.mrf.mxu1  ;;  %v3111_v35 = vpop.f32.mrf.mxu0 }
 0x20b   : > { %v3255_v14 = vadd.f32 %v5436_v20, %v3230_v38  ;;  %v3170_v49 = vadd.f32 %v3111_v35, %v2864_v4  ;;  %v2866_v12 = vadd.f32 %v2813_v47, %v5413_v32 }
 0x20c   : > { %v4354_v43 = vpop.f32.mrf.mxu1  ;;  %v4396_v33 = vpop.f32.mrf.mxu0 }
 0x20d   : > { %v3273_v61 = vmax.f32 %v3255_v14, 0.0  ;;  %v3231_v11 = vmul.f32 %v5429_v13, %v3170_v49 }
 0x20e   : > { %v2816_v5 = vpop.f32.mrf.mxu1  ;;  %v3114_v59 = vpop.f32.mrf.mxu0 }
 0x20f   : > { %v3846_v6 = vpack.c.bf16 %v3273_v61, %v3272_v0  ;;  %v3171_v21 = vadd.f32 %v3114_v59, %v2865_v2  ;;  %v3256_v17 = vadd.f32 %v5436_v20, %v3231_v11  ;;  %v2867_v23 = vadd.f32 %v2816_v5, %v5416_v41 }
 0x210   : > { %v4355_v7 = vpop.f32.mrf.mxu1  ;;  %v4397_v10 = vpop.f32.mrf.mxu0 }
 0x211   : > { %3866 = vst [vmem:[%s5448_s12 + $0x20] sm:$0xff] %v3846_v6   ;;  %v3232_v16 = vmul.f32 %v5429_v13, %v3171_v21  ;;  %v3274_v48 = vmax.f32 %v3256_v17, 0.0 }
 0x212   : > { %v2821_v18 = vpop.f32.mrf.mxu1  ;;  %v3119_v24 = vpop.f32.mrf.mxu0 }
 0x213   : > { %v3257_v55 = vadd.f32 %v5436_v20, %v3232_v16  ;;  %v3172_v19 = vadd.f32 %v3119_v24, %v2866_v12  ;;  %v2868_v30 = vadd.f32 %v2821_v18, %v5419_v50  ;;  %v2853_v50 = vld [vmem:[#allocation2 + $0x60] sm:$0x3f] }
 0x214   : > { %v4358_v42 = vpop.f32.mrf.mxu1  ;;  %v4400_v58 = vpop.f32.mrf.mxu0 }
 0x215   : > { %v3275_v25 = vmax.f32 %v3257_v55, 0.0  ;;  %v3233_v26 = vmul.f32 %v5429_v13, %v3172_v19 }
 0x216   : > { %v2824_v28 = vpop.f32.mrf.mxu1  ;;  %v3122_v32 = vpop.f32.mrf.mxu0 }
 0x217   : > { %v3851_v62 = vpack.c.bf16 %v3275_v25, %v3274_v48  ;;  %v3173_v27 = vadd.f32 %v3122_v32, %v2867_v23  ;;  %v3258_v31 = vadd.f32 %v5436_v20, %v3233_v26  ;;  %v2869_v44 = vadd.f32 %v2824_v28, %v5421_v57 }
 0x218   : > { %v4359_v9 = vpop.f32.mrf.mxu1  ;;  %v4401_v34 = vpop.f32.mrf.mxu0 }
 0x219   : > { %3867 = vst [vmem:[%s5448_s12 + $0x28] sm:$0xff] %v3851_v62   ;;  %v3234_v37 = vmul.f32 %v5429_v13, %v3173_v27  ;;  %v3276_v22 = vmax.f32 %v3258_v31, 0.0 }
 0x21a   : > { %v2829_v36 = vpop.f32.mrf.mxu1  ;;  %v3127_v39 = vpop.f32.mrf.mxu0 }
 0x21b   : > { %v3259_v41 = vadd.f32 %v5436_v20, %v3234_v37  ;;  %v3174_v29 = vadd.f32 %v3127_v39, %v2868_v30  ;;  %v2870_v53 = vadd.f32 %v2829_v36, %v5423_v63 }
 0x21c   : > { %v4362_v52 = vpop.f32.mrf.mxu1  ;;  %v4404_v40 = vpop.f32.mrf.mxu0 }
 0x21d   : > { %v3277_v45 = vmax.f32 %v3259_v41, 0.0  ;;  %v3235_v8 = vmul.f32 %v5429_v13, %v3174_v29 }
 0x21e   : > { %v2832_v46 = vpop.f32.mrf.mxu1  ;;  %v3130_v1 = vpop.f32.mrf.mxu0 }
 0x21f   : > { %v3856_v51 = vpack.c.bf16 %v3277_v45, %v3276_v22  ;;  %v2871_v54 = vadd.f32 %v2853_v50, %v2832_v46  ;;  %v3175_v60 = vadd.f32 %v3130_v1, %v2869_v44  ;;  %v3260_v4 = vadd.f32 %v5436_v20, %v3235_v8 }
 0x220   : > { %v4363_v3 = vpop.f32.mrf.mxu1  ;;  %v4405_v15 = vpop.f32.mrf.mxu0 }
 0x221   : > { %3868 = vst [vmem:[%s5448_s12 + $0x30] sm:$0xff] %v3856_v51   ;;  %2889 = vst [vmem:[#allocation2 + $0x60] sm:$0x3f] %v2871_v54  ;;  %v3236_v57 = vmul.f32 %v5429_v13, %v3175_v60  ;;  %v3278_v14 = vmax.f32 %v3260_v4, 0.0 }
 0x222   : > { %v3135_v56 = vpop.f32.mrf.mxu0 }
 0x223   : > { %v3261_v38 = vadd.f32 %v5436_v20, %v3236_v57  ;;  %v3176_v47 = vadd.f32 %v3135_v56, %v2870_v53 }
 0x224   : > { %v4408_v35 = vpop.f32.mrf.mxu0 }
 0x225   : > { %v3279_v49 = vmax.f32 %v3261_v38, 0.0  ;;  %v3237_v43 = vmul.f32 %v5429_v13, %v3176_v47 }
 0x226   : > { %v3138_v33 = vpop.f32.mrf.mxu0 }
 0x227   : > { %v3861_v0 = vpack.c.bf16 %v3279_v49, %v3278_v14  ;;  %v3262_v63 = vadd.f32 %v5436_v20, %v3237_v43 }
 0x228   : > { %v3159_v2 = vld [vmem:[#allocation2 + $0x60] sm:$0x3f]  ;;  %v4409_v61 = vpop.f32.mrf.mxu0 }
 0x229   : > { %3869 = vst [vmem:[%s5448_s12 + $0x38] sm:$0xff] %v3861_v0   ;;  %v3280_v11 = vmax.f32 %v3262_v63, 0.0  ;;  %v3177_v5 = vadd.f32 %v3159_v2, %v3138_v33 }
 0x22b   : > { %v3821_v59 = vpack.c.bf16 %v3280_v11, %v3280_v11  ;;  %3195 = vst [vmem:[#allocation2 + $0x60] sm:$0x3f] %v3177_v5 }
 0x22d   : > { %3370 = vst [vmem:[%s5448_s12 + $0x40] sm:$0xf] %v3821_v59 }
 0x232   : > { %v3213_v6 = vld [vmem:[#allocation2 + $0x60] sm:$0x3f] }
 0x233   : > { %v3238_v21 = vmul.f32 %v5429_v13, %v3213_v6 }
 0x235   : > { %v3263_v7 = vadd.f32 %v5436_v20, %v3238_v21 }
 0x237   : > { %v3281_v10 = vmax.f32 %v3263_v7, 0.0 }
 0x239   : > { %v3822_v12 = vpack.c.bf16 %v3281_v10, %v3281_v10 }
 0x23b   : > { %3371 = vst [vmem:[%s5448_s12 + $0x44] sm:$0x7] %v3822_v12 }
 0x23c PF: > { %s16_s23 = sadd.s32 1, %s4595_s23   ;;  %s5520_s21 = smov %s4591_s22 }
 0x23d   : > { %p13_p5 = scmp.ge.s32.totalorder %s16_s23, 4   ;;  %s5521_s22 = smov %s5523_s24 }
 0x23f   :  { %15 = sbr.rel (!%p13_p5) target bundleno = 2 (0x2), region = 88 }

</bundles_post_ra>
